<compile_context>
chip_gen: v6e
topology: v6e:2x2x1
jax: 0.10.0
libtpu: 0.0.40
codegen_flags: <defaults>
</compile_context>

<pallas_src>
import jax
import jax.numpy as jnp
import numpy as np
from jax import lax
from jax.experimental import pallas as pl
from jax.experimental.pallas import tpu as pltpu


def _pick_chunk_steps(seq_len: int, batch: int, target_rows: int = 256) -> int:
    """Smallest divisor of seq_len whose chunk fills >= target_rows MXU rows."""
    want = max(1, -(-target_rows // batch))        # ceil(target_rows / batch)
    if want >= seq_len:
        return seq_len
    for t in range(want, seq_len + 1):
        if seq_len % t == 0:
            return t
    return seq_len


def _make_encoder_kernel(num_layers: int, seq_len: int, batch: int,
                         emb_dim: int, hidden_dim: int, chunk_steps: int):
    L, S, B, E, H = num_layers, seq_len, batch, emb_dim, hidden_dim
    Tc = chunk_steps
    n_chunks = S // Tc
    # Bounded partial unroll: keeps LLO cross-iteration overlap without blowing
    # up instruction memory / vreg live ranges at large S.
    unroll_n = Tc if Tc <= 8 else 8
    # Restrict transcendentals to the lanes that need them only when each gate
    # slice is vreg(128-lane)-aligned.
    lane_sliced_transcendentals = (H % 128 == 0)

    def kernel(emb_ref, *args):
        # args = [w_ih_t, w_hh_t, bias] * L, hidden_ref, cell_ref, act_sc, xg_sc
        weight_refs = args[: 3 * L]
        hidden_ref, cell_ref, act_sc, xg_sc = args[3 * L:]

        for l in range(L):                        # static layer loop
            w_ih_t = weight_refs[3 * l][...]      # (in_dim, 4H)  bf16
            w_hh_t = weight_refs[3 * l + 1][...]  # (H, 4H)       bf16
            bias = weight_refs[3 * l + 2][...]    # (1, 4H)       f32 (b_ih + b_hh)

            h = jnp.zeros((B, H), jnp.float32)
            c = jnp.zeros((B, H), jnp.float32)

            for ck in range(n_chunks):            # static chunk loop
                base_row = ck * Tc * B

                # Input-to-hidden projection for this chunk of timesteps:
                # one big-M bf16 MXU matmul, f32 accumulation.
                if l == 0:
                    x_chunk = emb_ref[pl.ds(base_row, Tc * B), :]
                else:
                    x_chunk = act_sc[pl.ds(base_row, Tc * B), :]
                xg_sc[...] = (
                    jnp.dot(x_chunk, w_ih_t, preferred_element_type=jnp.float32)
                    + bias
                )  # (Tc*B, 4H) f32, PyTorch gate order: i, f, g, o

                def step(t, carry):
                    h_prev, c_prev = carry                     # (B, H) f32
                    row = pl.multiple_of(t * B, B)             # sublane-aligned
                    gates = xg_sc[pl.ds(row, B), :] + jnp.dot(
                        h_prev.astype(jnp.bfloat16), w_hh_t,
                        preferred_element_type=jnp.float32,
                    )                                          # (B, 4H) f32

                    if lane_sliced_transcendentals:
                        # sigmoid only over i,f and o; tanh only over g.
                        sif = jax.nn.sigmoid(gates[:, 0 * H:2 * H])
                        i_g = sif[:, 0 * H:1 * H]
                        f_g = sif[:, 1 * H:2 * H]
                        g_g = jnp.tanh(gates[:, 2 * H:3 * H])
                        o_g = jax.nn.sigmoid(gates[:, 3 * H:4 * H])
                    else:
                        # Toy H: (B, 4H) is ~one vreg; full-width is cheapest.
                        sig = jax.nn.sigmoid(gates)
                        th = jnp.tanh(gates)
                        i_g = sig[:, 0 * H:1 * H]
                        f_g = sig[:, 1 * H:2 * H]
                        g_g = th[:, 2 * H:3 * H]
                        o_g = sig[:, 3 * H:4 * H]

                    c_new = f_g * c_prev + i_g * g_g
                    h_new = o_g * jnp.tanh(c_new)

                    # This layer's h output at step t -> next layer's input
                    # (stored bf16: only ever consumed as a matmul LHS).
                    act_sc[pl.ds(base_row + row, B), :] = h_new.astype(act_sc.dtype)
                    return h_new, c_new

                h, c = lax.fori_loop(0, Tc, step, (h, c), unroll=unroll_n)

            # Final state for this layer, written into the lane-dense slabs.
            hidden_ref[pl.ds(l * B, B), :] = h
            cell_ref[pl.ds(l * B, B), :] = c

    return kernel


def encoder_forward(src, emb_table, lstm_params):
    """Pallas implementation of Encoder.forward (eval mode).

    src: [seq_len, batch] int32
    emb_table: [input_dim, emb_dim] float32
    lstm_params: list of (w_ih, w_hh, b_ih, b_hh) per layer, PyTorch layout:
        w_ih: [4H, in_dim], w_hh: [4H, H], b_*: [4H]
    returns (hidden, cell): each [num_layers, batch, hidden_dim] float32
    """
    seq_len, batch = src.shape
    emb_dim = emb_table.shape[1]
    num_layers = len(lstm_params)
    H = lstm_params[0][1].shape[1]

    # Glue: embedding gather + (identity) dropout + layout reshape in plain JAX.
    embedded = jnp.take(emb_table, src, axis=0)                         # (S, B, E)
    embedded2d = embedded.reshape(seq_len * batch, emb_dim).astype(jnp.bfloat16)

    # Pre-transpose weights so in-kernel matmuls are (rows, in) @ (in, 4H);
    # bf16 matmul operands, f32 fused bias.
    flat_weights = []
    for (w_ih, w_hh, b_ih, b_hh) in lstm_params:
        flat_weights.append(jnp.asarray(w_ih, jnp.float32).T.astype(jnp.bfloat16))  # (in, 4H)
        flat_weights.append(jnp.asarray(w_hh, jnp.float32).T.astype(jnp.bfloat16))  # (H, 4H)
        flat_weights.append((jnp.asarray(b_ih, jnp.float32)
                             + jnp.asarray(b_hh, jnp.float32))[None, :])            # (1, 4H)

    chunk_steps = _pick_chunk_steps(seq_len, batch, target_rows=256)

    # Explicit VMEM budget: inputs + weights + scratch + outputs, 2x headroom.
    weight_bytes = 0
    for l in range(num_layers):
        in_dim = emb_dim if l == 0 else H
        weight_bytes += in_dim * 4 * H * 2 + H * 4 * H * 2 + 4 * H * 4
    total_bytes = (
        seq_len * batch * emb_dim * 2                 # embedded (bf16)
        + weight_bytes
        + seq_len * batch * H * 2                     # act_sc (bf16)
        + chunk_steps * batch * 4 * H * 4             # xg_sc (f32)
        + 2 * num_layers * batch * H * 4              # hidden + cell outputs
    )
    vmem_limit = int(min(max(2 * total_bytes + (4 << 20), 16 << 20), 96 << 20))

    out_state = jax.ShapeDtypeStruct((num_layers * batch, H), jnp.float32)
    vmem_spec = pl.BlockSpec(memory_space=pltpu.MemorySpace.VMEM)  # whole array in VMEM

    kernel = _make_encoder_kernel(num_layers, seq_len, batch, emb_dim, H, chunk_steps)

    hidden2d, cell2d = pl.pallas_call(
        kernel,
        out_shape=(out_state, out_state),
        in_specs=[vmem_spec] * (1 + 3 * num_layers),
        out_specs=(vmem_spec, vmem_spec),
        scratch_shapes=[
            pltpu.VMEM((seq_len * batch, H), jnp.bfloat16),         # inter-layer activations
            pltpu.VMEM((chunk_steps * batch, 4 * H), jnp.float32),  # chunked x-path gates
        ],
        compiler_params=pltpu.CompilerParams(vmem_limit_bytes=vmem_limit),
    )(embedded2d, *flat_weights)

    hidden = hidden2d.reshape(num_layers, batch, H)
    cell = cell2d.reshape(num_layers, batch, H)
    return hidden, cell


def _reference_forward(src, emb_table, lstm_params):
    """Pure-JAX f32 reference (same math, lax.scan over time)."""
    embedded = jnp.take(emb_table, src, axis=0)
    num_layers = len(lstm_params)
    H = lstm_params[0][1].shape[1]
    batch = src.shape[1]

    def step(carry, x_t):
        h, c = carry  # each (L, B, H)
        new_h, new_c = [], []
        inp = x_t
        for l, (w_ih, w_hh, b_ih, b_hh) in enumerate(lstm_params):
            gates = inp @ w_ih.T + h[l] @ w_hh.T + b_ih + b_hh
            i_g = jax.nn.sigmoid(gates[:, 0 * H:1 * H])
            f_g = jax.nn.sigmoid(gates[:, 1 * H:2 * H])
            g_g = jnp.tanh(gates[:, 2 * H:3 * H])
            o_g = jax.nn.sigmoid(gates[:, 3 * H:4 * H])
            c_new = f_g * c[l] + i_g * g_g
            h_new = o_g * jnp.tanh(c_new)
            new_h.append(h_new)
            new_c.append(c_new)
            inp = h_new
        return (jnp.stack(new_h), jnp.stack(new_c)), None

    init = (jnp.zeros((num_layers, batch, H), jnp.float32),
            jnp.zeros((num_layers, batch, H), jnp.float32))
    (h, c), _ = jax.lax.scan(step, init, embedded)
    return h, c


if __name__ == "__main__":
    # Module hyperparameters (small, consistent with the forward pass).
    input_dim = 50      # vocab size
    emb_dim = 32
    hidden_dim = 32
    num_layers = 2
    seq_len = 8
    batch = 8

    key = jax.random.PRNGKey(0)
    keys = jax.random.split(key, 2 + 4 * num_layers)

    # Deterministic synthetic parameters (shapes follow nn.Embedding / nn.LSTM).
    emb_table = jax.random.normal(keys[0], (input_dim, emb_dim), jnp.float32)
    bound = 1.0 / np.sqrt(hidden_dim)
    lstm_params = []
    for l in range(num_layers):
        in_dim = emb_dim if l == 0 else hidden_dim
        k0, k1, k2, k3 = keys[2 + 4 * l: 2 + 4 * (l + 1)]
        w_ih = jax.random.uniform(k0, (4 * hidden_dim, in_dim), jnp.float32, -bound, bound)
        w_hh = jax.random.uniform(k1, (4 * hidden_dim, hidden_dim), jnp.float32, -bound, bound)
        b_ih = jax.random.uniform(k2, (4 * hidden_dim,), jnp.float32, -bound, bound)
        b_hh = jax.random.uniform(k3, (4 * hidden_dim,), jnp.float32, -bound, bound)
        lstm_params.append((w_ih, w_hh, b_ih, b_hh))

    src = jax.random.randint(keys[1], (seq_len, batch), 0, input_dim, jnp.int32)

    hidden, cell = encoder_forward(src, emb_table, lstm_params)
    jax.block_until_ready((hidden, cell))

    # Sanity check vs. pure-JAX f32 reference (tolerance loosened for bf16
    # matmul operands; accumulation and gate math are f32).
    h_ref, c_ref = _reference_forward(src, emb_table, lstm_params)
    np.testing.assert_allclose(np.asarray(hidden), np.asarray(h_ref), rtol=3e-2, atol=3e-2)
    np.testing.assert_allclose(np.asarray(cell), np.asarray(c_ref), rtol=3e-2, atol=3e-2)

    assert hidden.shape == (num_layers, batch, hidden_dim)
    assert cell.shape == (num_layers, batch, hidden_dim)
    print("KERNEL_OK")
</pallas_src>

<mosaic_0001>
module attributes {stable_mosaic.version = 11 : i64} {
  func.func @kernel(%arg0: memref<64x32xbf16, #tpu.memory_space<vmem>>, %arg1: memref<32x128xbf16, #tpu.memory_space<vmem>>, %arg2: memref<32x128xbf16, #tpu.memory_space<vmem>>, %arg3: memref<1x128xf32, #tpu.memory_space<vmem>>, %arg4: memref<32x128xbf16, #tpu.memory_space<vmem>>, %arg5: memref<32x128xbf16, #tpu.memory_space<vmem>>, %arg6: memref<1x128xf32, #tpu.memory_space<vmem>>, %arg7: memref<16x32xf32, #tpu.memory_space<vmem>>, %arg8: memref<16x32xf32, #tpu.memory_space<vmem>>, %arg9: memref<64x32xbf16, #tpu.memory_space<vmem>>, %arg10: memref<64x128xf32, #tpu.memory_space<vmem>>) attributes {dimension_semantics = [], scalar_prefetch = 0 : i64, scratch_operands = 2 : i64, tpu.core_type = #tpu.core_type<tc>} {
    %c0 = arith.constant 0 : index
    %c0_0 = arith.constant 0 : index
    %0 = vector.load %arg1[%c0, %c0_0] : memref<32x128xbf16, #tpu.memory_space<vmem>>, vector<32x128xbf16>
    %c0_1 = arith.constant 0 : index
    %c0_2 = arith.constant 0 : index
    %1 = vector.load %arg2[%c0_1, %c0_2] : memref<32x128xbf16, #tpu.memory_space<vmem>>, vector<32x128xbf16>
    %c0_3 = arith.constant 0 : index
    %c0_4 = arith.constant 0 : index
    %2 = vector.load %arg3[%c0_3, %c0_4] : memref<1x128xf32, #tpu.memory_space<vmem>>, vector<1x128xf32>
    %cst = arith.constant 0.000000e+00 : f32
    %3 = vector.broadcast %cst : f32 to vector<8x32xf32>
    %cst_5 = arith.constant 0.000000e+00 : f32
    %4 = vector.broadcast %cst_5 : f32 to vector<8x32xf32>
    %c0_6 = arith.constant 0 : index
    %c0_7 = arith.constant 0 : index
    %5 = vector.load %arg0[%c0_6, %c0_7] : memref<64x32xbf16, #tpu.memory_space<vmem>>, vector<64x32xbf16>
    %cst_8 = arith.constant dense<0.000000e+00> : vector<64x128xf32>
    %6 = tpu.matmul %5, %0, %cst_8 {dimension_numbers = #tpu.dot_dimension_numbers<[1], [0], [0], [1], [0, 0, 1, 1], [], []>} : vector<64x32xbf16>, vector<32x128xbf16>, vector<64x128xf32> -> vector<64x128xf32>
    %7 = vector.broadcast %2 : vector<1x128xf32> to vector<64x128xf32>
    %8 = arith.addf %6, %7 : vector<64x128xf32>
    %c0_9 = arith.constant 0 : index
    %c0_10 = arith.constant 0 : index
    %9 = vector.load %arg10[%c0_9, %c0_10] : memref<64x128xf32, #tpu.memory_space<vmem>>, vector<64x128xf32>
    tpu.vector_store %arg10[%c0_9, %c0_10], %8 {strides = array<i32>} : memref<64x128xf32, #tpu.memory_space<vmem>>, vector<64x128xf32>,
    %c0_i32 = arith.constant 0 : i32
    %c8_i32 = arith.constant 8 : i32
    %10 = arith.muli %c0_i32, %c8_i32 : i32
    %11 = tpu.assume_multiple %10, 8 : i32
    %12 = arith.index_cast %11 : i32 to index
    %c0_11 = arith.constant 0 : index
    %13 = vector.load %arg10[%12, %c0_11] : memref<64x128xf32, #tpu.memory_space<vmem>>, vector<8x128xf32>
    %14 = arith.truncf %3 : vector<8x32xf32> to vector<8x32xbf16>
    %cst_12 = arith.constant dense<0.000000e+00> : vector<8x128xf32>
    %15 = tpu.matmul %14, %1, %cst_12 {dimension_numbers = #tpu.dot_dimension_numbers<[1], [0], [0], [1], [0, 0, 1, 1], [], []>} : vector<8x32xbf16>, vector<32x128xbf16>, vector<8x128xf32> -> vector<8x128xf32>
    %16 = arith.addf %13, %15 : vector<8x128xf32>
    %17 = arith.negf %16 : vector<8x128xf32>
    %18 = math.exp %17 : vector<8x128xf32>
    %cst_13 = arith.constant 1.000000e+00 : f32
    %19 = vector.broadcast %cst_13 : f32 to vector<8x128xf32>
    %20 = arith.addf %19, %18 : vector<8x128xf32>
    %21 = arith.divf %19, %20 : vector<8x128xf32>
    %22 = math.tanh %16 : vector<8x128xf32>
    %23 = vector.extract_strided_slice %21 {offsets = [0, 0], sizes = [8, 32], strides = [1, 1]} : vector<8x128xf32> to vector<8x32xf32>
    %24 = vector.extract_strided_slice %21 {offsets = [0, 32], sizes = [8, 32], strides = [1, 1]} : vector<8x128xf32> to vector<8x32xf32>
    %25 = vector.extract_strided_slice %22 {offsets = [0, 64], sizes = [8, 32], strides = [1, 1]} : vector<8x128xf32> to vector<8x32xf32>
    %26 = vector.extract_strided_slice %21 {offsets = [0, 96], sizes = [8, 32], strides = [1, 1]} : vector<8x128xf32> to vector<8x32xf32>
    %27 = arith.mulf %24, %4 : vector<8x32xf32>
    %28 = arith.mulf %23, %25 : vector<8x32xf32>
    %29 = arith.addf %27, %28 : vector<8x32xf32>
    %30 = math.tanh %29 : vector<8x32xf32>
    %31 = arith.mulf %26, %30 : vector<8x32xf32>
    %32 = arith.truncf %31 : vector<8x32xf32> to vector<8x32xbf16>
    %c0_i32_14 = arith.constant 0 : i32
    %33 = arith.addi %c0_i32_14, %11 : i32
    %34 = arith.index_cast %33 : i32 to index
    %c0_15 = arith.constant 0 : index
    %35 = vector.load %arg9[%34, %c0_15] : memref<64x32xbf16, #tpu.memory_space<vmem>>, vector<8x32xbf16>
    tpu.vector_store %arg9[%34, %c0_15], %32 {strides = array<i32>} : memref<64x32xbf16, #tpu.memory_space<vmem>>, vector<8x32xbf16>,
    %c1_i32 = arith.constant 1 : i32
    %c8_i32_16 = arith.constant 8 : i32
    %36 = arith.muli %c1_i32, %c8_i32_16 : i32
    %37 = tpu.assume_multiple %36, 8 : i32
    %38 = arith.index_cast %37 : i32 to index
    %c0_17 = arith.constant 0 : index
    %39 = vector.load %arg10[%38, %c0_17] : memref<64x128xf32, #tpu.memory_space<vmem>>, vector<8x128xf32>
    %40 = arith.truncf %31 : vector<8x32xf32> to vector<8x32xbf16>
    %cst_18 = arith.constant dense<0.000000e+00> : vector<8x128xf32>
    %41 = tpu.matmul %40, %1, %cst_18 {dimension_numbers = #tpu.dot_dimension_numbers<[1], [0], [0], [1], [0, 0, 1, 1], [], []>} : vector<8x32xbf16>, vector<32x128xbf16>, vector<8x128xf32> -> vector<8x128xf32>
    %42 = arith.addf %39, %41 : vector<8x128xf32>
    %43 = arith.negf %42 : vector<8x128xf32>
    %44 = math.exp %43 : vector<8x128xf32>
    %cst_19 = arith.constant 1.000000e+00 : f32
    %45 = vector.broadcast %cst_19 : f32 to vector<8x128xf32>
    %46 = arith.addf %45, %44 : vector<8x128xf32>
    %47 = arith.divf %45, %46 : vector<8x128xf32>
    %48 = math.tanh %42 : vector<8x128xf32>
    %49 = vector.extract_strided_slice %47 {offsets = [0, 0], sizes = [8, 32], strides = [1, 1]} : vector<8x128xf32> to vector<8x32xf32>
    %50 = vector.extract_strided_slice %47 {offsets = [0, 32], sizes = [8, 32], strides = [1, 1]} : vector<8x128xf32> to vector<8x32xf32>
    %51 = vector.extract_strided_slice %48 {offsets = [0, 64], sizes = [8, 32], strides = [1, 1]} : vector<8x128xf32> to vector<8x32xf32>
    %52 = vector.extract_strided_slice %47 {offsets = [0, 96], sizes = [8, 32], strides = [1, 1]} : vector<8x128xf32> to vector<8x32xf32>
    %53 = arith.mulf %50, %29 : vector<8x32xf32>
    %54 = arith.mulf %49, %51 : vector<8x32xf32>
    %55 = arith.addf %53, %54 : vector<8x32xf32>
    %56 = math.tanh %55 : vector<8x32xf32>
    %57 = arith.mulf %52, %56 : vector<8x32xf32>
    %58 = arith.truncf %57 : vector<8x32xf32> to vector<8x32xbf16>
    %c0_i32_20 = arith.constant 0 : i32
    %59 = arith.addi %c0_i32_20, %37 : i32
    %60 = arith.index_cast %59 : i32 to index
    %c0_21 = arith.constant 0 : index
    %61 = vector.load %arg9[%60, %c0_21] : memref<64x32xbf16, #tpu.memory_space<vmem>>, vector<8x32xbf16>
    tpu.vector_store %arg9[%60, %c0_21], %58 {strides = array<i32>} : memref<64x32xbf16, #tpu.memory_space<vmem>>, vector<8x32xbf16>,
    %c2_i32 = arith.constant 2 : i32
    %c8_i32_22 = arith.constant 8 : i32
    %62 = arith.muli %c2_i32, %c8_i32_22 : i32
    %63 = tpu.assume_multiple %62, 8 : i32
    %64 = arith.index_cast %63 : i32 to index
    %c0_23 = arith.constant 0 : index
    %65 = vector.load %arg10[%64, %c0_23] : memref<64x128xf32, #tpu.memory_space<vmem>>, vector<8x128xf32>
    %66 = arith.truncf %57 : vector<8x32xf32> to vector<8x32xbf16>
    %cst_24 = arith.constant dense<0.000000e+00> : vector<8x128xf32>
    %67 = tpu.matmul %66, %1, %cst_24 {dimension_numbers = #tpu.dot_dimension_numbers<[1], [0], [0], [1], [0, 0, 1, 1], [], []>} : vector<8x32xbf16>, vector<32x128xbf16>, vector<8x128xf32> -> vector<8x128xf32>
    %68 = arith.addf %65, %67 : vector<8x128xf32>
    %69 = arith.negf %68 : vector<8x128xf32>
    %70 = math.exp %69 : vector<8x128xf32>
    %cst_25 = arith.constant 1.000000e+00 : f32
    %71 = vector.broadcast %cst_25 : f32 to vector<8x128xf32>
    %72 = arith.addf %71, %70 : vector<8x128xf32>
    %73 = arith.divf %71, %72 : vector<8x128xf32>
    %74 = math.tanh %68 : vector<8x128xf32>
    %75 = vector.extract_strided_slice %73 {offsets = [0, 0], sizes = [8, 32], strides = [1, 1]} : vector<8x128xf32> to vector<8x32xf32>
    %76 = vector.extract_strided_slice %73 {offsets = [0, 32], sizes = [8, 32], strides = [1, 1]} : vector<8x128xf32> to vector<8x32xf32>
    %77 = vector.extract_strided_slice %74 {offsets = [0, 64], sizes = [8, 32], strides = [1, 1]} : vector<8x128xf32> to vector<8x32xf32>
    %78 = vector.extract_strided_slice %73 {offsets = [0, 96], sizes = [8, 32], strides = [1, 1]} : vector<8x128xf32> to vector<8x32xf32>
    %79 = arith.mulf %76, %55 : vector<8x32xf32>
    %80 = arith.mulf %75, %77 : vector<8x32xf32>
    %81 = arith.addf %79, %80 : vector<8x32xf32>
    %82 = math.tanh %81 : vector<8x32xf32>
    %83 = arith.mulf %78, %82 : vector<8x32xf32>
    %84 = arith.truncf %83 : vector<8x32xf32> to vector<8x32xbf16>
    %c0_i32_26 = arith.constant 0 : i32
    %85 = arith.addi %c0_i32_26, %63 : i32
    %86 = arith.index_cast %85 : i32 to index
    %c0_27 = arith.constant 0 : index
    %87 = vector.load %arg9[%86, %c0_27] : memref<64x32xbf16, #tpu.memory_space<vmem>>, vector<8x32xbf16>
    tpu.vector_store %arg9[%86, %c0_27], %84 {strides = array<i32>} : memref<64x32xbf16, #tpu.memory_space<vmem>>, vector<8x32xbf16>,
    %c3_i32 = arith.constant 3 : i32
    %c8_i32_28 = arith.constant 8 : i32
    %88 = arith.muli %c3_i32, %c8_i32_28 : i32
    %89 = tpu.assume_multiple %88, 8 : i32
    %90 = arith.index_cast %89 : i32 to index
    %c0_29 = arith.constant 0 : index
    %91 = vector.load %arg10[%90, %c0_29] : memref<64x128xf32, #tpu.memory_space<vmem>>, vector<8x128xf32>
    %92 = arith.truncf %83 : vector<8x32xf32> to vector<8x32xbf16>
    %cst_30 = arith.constant dense<0.000000e+00> : vector<8x128xf32>
    %93 = tpu.matmul %92, %1, %cst_30 {dimension_numbers = #tpu.dot_dimension_numbers<[1], [0], [0], [1], [0, 0, 1, 1], [], []>} : vector<8x32xbf16>, vector<32x128xbf16>, vector<8x128xf32> -> vector<8x128xf32>
    %94 = arith.addf %91, %93 : vector<8x128xf32>
    %95 = arith.negf %94 : vector<8x128xf32>
    %96 = math.exp %95 : vector<8x128xf32>
    %cst_31 = arith.constant 1.000000e+00 : f32
    %97 = vector.broadcast %cst_31 : f32 to vector<8x128xf32>
    %98 = arith.addf %97, %96 : vector<8x128xf32>
    %99 = arith.divf %97, %98 : vector<8x128xf32>
    %100 = math.tanh %94 : vector<8x128xf32>
    %101 = vector.extract_strided_slice %99 {offsets = [0, 0], sizes = [8, 32], strides = [1, 1]} : vector<8x128xf32> to vector<8x32xf32>
    %102 = vector.extract_strided_slice %99 {offsets = [0, 32], sizes = [8, 32], strides = [1, 1]} : vector<8x128xf32> to vector<8x32xf32>
    %103 = vector.extract_strided_slice %100 {offsets = [0, 64], sizes = [8, 32], strides = [1, 1]} : vector<8x128xf32> to vector<8x32xf32>
    %104 = vector.extract_strided_slice %99 {offsets = [0, 96], sizes = [8, 32], strides = [1, 1]} : vector<8x128xf32> to vector<8x32xf32>
    %105 = arith.mulf %102, %81 : vector<8x32xf32>
    %106 = arith.mulf %101, %103 : vector<8x32xf32>
    %107 = arith.addf %105, %106 : vector<8x32xf32>
    %108 = math.tanh %107 : vector<8x32xf32>
    %109 = arith.mulf %104, %108 : vector<8x32xf32>
    %110 = arith.truncf %109 : vector<8x32xf32> to vector<8x32xbf16>
    %c0_i32_32 = arith.constant 0 : i32
    %111 = arith.addi %c0_i32_32, %89 : i32
    %112 = arith.index_cast %111 : i32 to index
    %c0_33 = arith.constant 0 : index
    %113 = vector.load %arg9[%112, %c0_33] : memref<64x32xbf16, #tpu.memory_space<vmem>>, vector<8x32xbf16>
    tpu.vector_store %arg9[%112, %c0_33], %110 {strides = array<i32>} : memref<64x32xbf16, #tpu.memory_space<vmem>>, vector<8x32xbf16>,
    %c4_i32 = arith.constant 4 : i32
    %c8_i32_34 = arith.constant 8 : i32
    %114 = arith.muli %c4_i32, %c8_i32_34 : i32
    %115 = tpu.assume_multiple %114, 8 : i32
    %116 = arith.index_cast %115 : i32 to index
    %c0_35 = arith.constant 0 : index
    %117 = vector.load %arg10[%116, %c0_35] : memref<64x128xf32, #tpu.memory_space<vmem>>, vector<8x128xf32>
    %118 = arith.truncf %109 : vector<8x32xf32> to vector<8x32xbf16>
    %cst_36 = arith.constant dense<0.000000e+00> : vector<8x128xf32>
    %119 = tpu.matmul %118, %1, %cst_36 {dimension_numbers = #tpu.dot_dimension_numbers<[1], [0], [0], [1], [0, 0, 1, 1], [], []>} : vector<8x32xbf16>, vector<32x128xbf16>, vector<8x128xf32> -> vector<8x128xf32>
    %120 = arith.addf %117, %119 : vector<8x128xf32>
    %121 = arith.negf %120 : vector<8x128xf32>
    %122 = math.exp %121 : vector<8x128xf32>
    %cst_37 = arith.constant 1.000000e+00 : f32
    %123 = vector.broadcast %cst_37 : f32 to vector<8x128xf32>
    %124 = arith.addf %123, %122 : vector<8x128xf32>
    %125 = arith.divf %123, %124 : vector<8x128xf32>
    %126 = math.tanh %120 : vector<8x128xf32>
    %127 = vector.extract_strided_slice %125 {offsets = [0, 0], sizes = [8, 32], strides = [1, 1]} : vector<8x128xf32> to vector<8x32xf32>
    %128 = vector.extract_strided_slice %125 {offsets = [0, 32], sizes = [8, 32], strides = [1, 1]} : vector<8x128xf32> to vector<8x32xf32>
    %129 = vector.extract_strided_slice %126 {offsets = [0, 64], sizes = [8, 32], strides = [1, 1]} : vector<8x128xf32> to vector<8x32xf32>
    %130 = vector.extract_strided_slice %125 {offsets = [0, 96], sizes = [8, 32], strides = [1, 1]} : vector<8x128xf32> to vector<8x32xf32>
    %131 = arith.mulf %128, %107 : vector<8x32xf32>
    %132 = arith.mulf %127, %129 : vector<8x32xf32>
    %133 = arith.addf %131, %132 : vector<8x32xf32>
    %134 = math.tanh %133 : vector<8x32xf32>
    %135 = arith.mulf %130, %134 : vector<8x32xf32>
    %136 = arith.truncf %135 : vector<8x32xf32> to vector<8x32xbf16>
    %c0_i32_38 = arith.constant 0 : i32
    %137 = arith.addi %c0_i32_38, %115 : i32
    %138 = arith.index_cast %137 : i32 to index
    %c0_39 = arith.constant 0 : index
    %139 = vector.load %arg9[%138, %c0_39] : memref<64x32xbf16, #tpu.memory_space<vmem>>, vector<8x32xbf16>
    tpu.vector_store %arg9[%138, %c0_39], %136 {strides = array<i32>} : memref<64x32xbf16, #tpu.memory_space<vmem>>, vector<8x32xbf16>,
    %c5_i32 = arith.constant 5 : i32
    %c8_i32_40 = arith.constant 8 : i32
    %140 = arith.muli %c5_i32, %c8_i32_40 : i32
    %141 = tpu.assume_multiple %140, 8 : i32
    %142 = arith.index_cast %141 : i32 to index
    %c0_41 = arith.constant 0 : index
    %143 = vector.load %arg10[%142, %c0_41] : memref<64x128xf32, #tpu.memory_space<vmem>>, vector<8x128xf32>
    %144 = arith.truncf %135 : vector<8x32xf32> to vector<8x32xbf16>
    %cst_42 = arith.constant dense<0.000000e+00> : vector<8x128xf32>
    %145 = tpu.matmul %144, %1, %cst_42 {dimension_numbers = #tpu.dot_dimension_numbers<[1], [0], [0], [1], [0, 0, 1, 1], [], []>} : vector<8x32xbf16>, vector<32x128xbf16>, vector<8x128xf32> -> vector<8x128xf32>
    %146 = arith.addf %143, %145 : vector<8x128xf32>
    %147 = arith.negf %146 : vector<8x128xf32>
    %148 = math.exp %147 : vector<8x128xf32>
    %cst_43 = arith.constant 1.000000e+00 : f32
    %149 = vector.broadcast %cst_43 : f32 to vector<8x128xf32>
    %150 = arith.addf %149, %148 : vector<8x128xf32>
    %151 = arith.divf %149, %150 : vector<8x128xf32>
    %152 = math.tanh %146 : vector<8x128xf32>
    %153 = vector.extract_strided_slice %151 {offsets = [0, 0], sizes = [8, 32], strides = [1, 1]} : vector<8x128xf32> to vector<8x32xf32>
    %154 = vector.extract_strided_slice %151 {offsets = [0, 32], sizes = [8, 32], strides = [1, 1]} : vector<8x128xf32> to vector<8x32xf32>
    %155 = vector.extract_strided_slice %152 {offsets = [0, 64], sizes = [8, 32], strides = [1, 1]} : vector<8x128xf32> to vector<8x32xf32>
    %156 = vector.extract_strided_slice %151 {offsets = [0, 96], sizes = [8, 32], strides = [1, 1]} : vector<8x128xf32> to vector<8x32xf32>
    %157 = arith.mulf %154, %133 : vector<8x32xf32>
    %158 = arith.mulf %153, %155 : vector<8x32xf32>
    %159 = arith.addf %157, %158 : vector<8x32xf32>
    %160 = math.tanh %159 : vector<8x32xf32>
    %161 = arith.mulf %156, %160 : vector<8x32xf32>
    %162 = arith.truncf %161 : vector<8x32xf32> to vector<8x32xbf16>
    %c0_i32_44 = arith.constant 0 : i32
    %163 = arith.addi %c0_i32_44, %141 : i32
    %164 = arith.index_cast %163 : i32 to index
    %c0_45 = arith.constant 0 : index
    %165 = vector.load %arg9[%164, %c0_45] : memref<64x32xbf16, #tpu.memory_space<vmem>>, vector<8x32xbf16>
    tpu.vector_store %arg9[%164, %c0_45], %162 {strides = array<i32>} : memref<64x32xbf16, #tpu.memory_space<vmem>>, vector<8x32xbf16>,
    %c6_i32 = arith.constant 6 : i32
    %c8_i32_46 = arith.constant 8 : i32
    %166 = arith.muli %c6_i32, %c8_i32_46 : i32
    %167 = tpu.assume_multiple %166, 8 : i32
    %168 = arith.index_cast %167 : i32 to index
    %c0_47 = arith.constant 0 : index
    %169 = vector.load %arg10[%168, %c0_47] : memref<64x128xf32, #tpu.memory_space<vmem>>, vector<8x128xf32>
    %170 = arith.truncf %161 : vector<8x32xf32> to vector<8x32xbf16>
    %cst_48 = arith.constant dense<0.000000e+00> : vector<8x128xf32>
    %171 = tpu.matmul %170, %1, %cst_48 {dimension_numbers = #tpu.dot_dimension_numbers<[1], [0], [0], [1], [0, 0, 1, 1], [], []>} : vector<8x32xbf16>, vector<32x128xbf16>, vector<8x128xf32> -> vector<8x128xf32>
    %172 = arith.addf %169, %171 : vector<8x128xf32>
    %173 = arith.negf %172 : vector<8x128xf32>
    %174 = math.exp %173 : vector<8x128xf32>
    %cst_49 = arith.constant 1.000000e+00 : f32
    %175 = vector.broadcast %cst_49 : f32 to vector<8x128xf32>
    %176 = arith.addf %175, %174 : vector<8x128xf32>
    %177 = arith.divf %175, %176 : vector<8x128xf32>
    %178 = math.tanh %172 : vector<8x128xf32>
    %179 = vector.extract_strided_slice %177 {offsets = [0, 0], sizes = [8, 32], strides = [1, 1]} : vector<8x128xf32> to vector<8x32xf32>
    %180 = vector.extract_strided_slice %177 {offsets = [0, 32], sizes = [8, 32], strides = [1, 1]} : vector<8x128xf32> to vector<8x32xf32>
    %181 = vector.extract_strided_slice %178 {offsets = [0, 64], sizes = [8, 32], strides = [1, 1]} : vector<8x128xf32> to vector<8x32xf32>
    %182 = vector.extract_strided_slice %177 {offsets = [0, 96], sizes = [8, 32], strides = [1, 1]} : vector<8x128xf32> to vector<8x32xf32>
    %183 = arith.mulf %180, %159 : vector<8x32xf32>
    %184 = arith.mulf %179, %181 : vector<8x32xf32>
    %185 = arith.addf %183, %184 : vector<8x32xf32>
    %186 = math.tanh %185 : vector<8x32xf32>
    %187 = arith.mulf %182, %186 : vector<8x32xf32>
    %188 = arith.truncf %187 : vector<8x32xf32> to vector<8x32xbf16>
    %c0_i32_50 = arith.constant 0 : i32
    %189 = arith.addi %c0_i32_50, %167 : i32
    %190 = arith.index_cast %189 : i32 to index
    %c0_51 = arith.constant 0 : index
    %191 = vector.load %arg9[%190, %c0_51] : memref<64x32xbf16, #tpu.memory_space<vmem>>, vector<8x32xbf16>
    tpu.vector_store %arg9[%190, %c0_51], %188 {strides = array<i32>} : memref<64x32xbf16, #tpu.memory_space<vmem>>, vector<8x32xbf16>,
    %c7_i32 = arith.constant 7 : i32
    %c8_i32_52 = arith.constant 8 : i32
    %192 = arith.muli %c7_i32, %c8_i32_52 : i32
    %193 = tpu.assume_multiple %192, 8 : i32
    %194 = arith.index_cast %193 : i32 to index
    %c0_53 = arith.constant 0 : index
    %195 = vector.load %arg10[%194, %c0_53] : memref<64x128xf32, #tpu.memory_space<vmem>>, vector<8x128xf32>
    %196 = arith.truncf %187 : vector<8x32xf32> to vector<8x32xbf16>
    %cst_54 = arith.constant dense<0.000000e+00> : vector<8x128xf32>
    %197 = tpu.matmul %196, %1, %cst_54 {dimension_numbers = #tpu.dot_dimension_numbers<[1], [0], [0], [1], [0, 0, 1, 1], [], []>} : vector<8x32xbf16>, vector<32x128xbf16>, vector<8x128xf32> -> vector<8x128xf32>
    %198 = arith.addf %195, %197 : vector<8x128xf32>
    %199 = arith.negf %198 : vector<8x128xf32>
    %200 = math.exp %199 : vector<8x128xf32>
    %cst_55 = arith.constant 1.000000e+00 : f32
    %201 = vector.broadcast %cst_55 : f32 to vector<8x128xf32>
    %202 = arith.addf %201, %200 : vector<8x128xf32>
    %203 = arith.divf %201, %202 : vector<8x128xf32>
    %204 = math.tanh %198 : vector<8x128xf32>
    %205 = vector.extract_strided_slice %203 {offsets = [0, 0], sizes = [8, 32], strides = [1, 1]} : vector<8x128xf32> to vector<8x32xf32>
    %206 = vector.extract_strided_slice %203 {offsets = [0, 32], sizes = [8, 32], strides = [1, 1]} : vector<8x128xf32> to vector<8x32xf32>
    %207 = vector.extract_strided_slice %204 {offsets = [0, 64], sizes = [8, 32], strides = [1, 1]} : vector<8x128xf32> to vector<8x32xf32>
    %208 = vector.extract_strided_slice %203 {offsets = [0, 96], sizes = [8, 32], strides = [1, 1]} : vector<8x128xf32> to vector<8x32xf32>
    %209 = arith.mulf %206, %185 : vector<8x32xf32>
    %210 = arith.mulf %205, %207 : vector<8x32xf32>
    %211 = arith.addf %209, %210 : vector<8x32xf32>
    %212 = math.tanh %211 : vector<8x32xf32>
    %213 = arith.mulf %208, %212 : vector<8x32xf32>
    %214 = arith.truncf %213 : vector<8x32xf32> to vector<8x32xbf16>
    %c0_i32_56 = arith.constant 0 : i32
    %215 = arith.addi %c0_i32_56, %193 : i32
    %216 = arith.index_cast %215 : i32 to index
    %c0_57 = arith.constant 0 : index
    %217 = vector.load %arg9[%216, %c0_57] : memref<64x32xbf16, #tpu.memory_space<vmem>>, vector<8x32xbf16>
    tpu.vector_store %arg9[%216, %c0_57], %214 {strides = array<i32>} : memref<64x32xbf16, #tpu.memory_space<vmem>>, vector<8x32xbf16>,
    %c8_i32_58 = arith.constant 8 : i32
    %c0_59 = arith.constant 0 : index
    %c0_60 = arith.constant 0 : index
    %218 = vector.load %arg7[%c0_59, %c0_60] : memref<16x32xf32, #tpu.memory_space<vmem>>, vector<8x32xf32>
    tpu.vector_store %arg7[%c0_59, %c0_60], %213 {strides = array<i32>} : memref<16x32xf32, #tpu.memory_space<vmem>>, vector<8x32xf32>,
    %c0_61 = arith.constant 0 : index
    %c0_62 = arith.constant 0 : index
    %219 = vector.load %arg8[%c0_61, %c0_62] : memref<16x32xf32, #tpu.memory_space<vmem>>, vector<8x32xf32>
    tpu.vector_store %arg8[%c0_61, %c0_62], %211 {strides = array<i32>} : memref<16x32xf32, #tpu.memory_space<vmem>>, vector<8x32xf32>,
    %c0_63 = arith.constant 0 : index
    %c0_64 = arith.constant 0 : index
    %220 = vector.load %arg4[%c0_63, %c0_64] : memref<32x128xbf16, #tpu.memory_space<vmem>>, vector<32x128xbf16>
    %c0_65 = arith.constant 0 : index
    %c0_66 = arith.constant 0 : index
    %221 = vector.load %arg5[%c0_65, %c0_66] : memref<32x128xbf16, #tpu.memory_space<vmem>>, vector<32x128xbf16>
    %c0_67 = arith.constant 0 : index
    %c0_68 = arith.constant 0 : index
    %222 = vector.load %arg6[%c0_67, %c0_68] : memref<1x128xf32, #tpu.memory_space<vmem>>, vector<1x128xf32>
    %cst_69 = arith.constant 0.000000e+00 : f32
    %223 = vector.broadcast %cst_69 : f32 to vector<8x32xf32>
    %cst_70 = arith.constant 0.000000e+00 : f32
    %224 = vector.broadcast %cst_70 : f32 to vector<8x32xf32>
    %c0_71 = arith.constant 0 : index
    %c0_72 = arith.constant 0 : index
    %225 = vector.load %arg9[%c0_71, %c0_72] : memref<64x32xbf16, #tpu.memory_space<vmem>>, vector<64x32xbf16>
    %cst_73 = arith.constant dense<0.000000e+00> : vector<64x128xf32>
    %226 = tpu.matmul %225, %220, %cst_73 {dimension_numbers = #tpu.dot_dimension_numbers<[1], [0], [0], [1], [0, 0, 1, 1], [], []>} : vector<64x32xbf16>, vector<32x128xbf16>, vector<64x128xf32> -> vector<64x128xf32>
    %227 = vector.broadcast %222 : vector<1x128xf32> to vector<64x128xf32>
    %228 = arith.addf %226, %227 : vector<64x128xf32>
    %c0_74 = arith.constant 0 : index
    %c0_75 = arith.constant 0 : index
    %229 = vector.load %arg10[%c0_74, %c0_75] : memref<64x128xf32, #tpu.memory_space<vmem>>, vector<64x128xf32>
    tpu.vector_store %arg10[%c0_74, %c0_75], %228 {strides = array<i32>} : memref<64x128xf32, #tpu.memory_space<vmem>>, vector<64x128xf32>,
    %c0_i32_76 = arith.constant 0 : i32
    %c8_i32_77 = arith.constant 8 : i32
    %230 = arith.muli %c0_i32_76, %c8_i32_77 : i32
    %231 = tpu.assume_multiple %230, 8 : i32
    %232 = arith.index_cast %231 : i32 to index
    %c0_78 = arith.constant 0 : index
    %233 = vector.load %arg10[%232, %c0_78] : memref<64x128xf32, #tpu.memory_space<vmem>>, vector<8x128xf32>
    %234 = arith.truncf %223 : vector<8x32xf32> to vector<8x32xbf16>
    %cst_79 = arith.constant dense<0.000000e+00> : vector<8x128xf32>
    %235 = tpu.matmul %234, %221, %cst_79 {dimension_numbers = #tpu.dot_dimension_numbers<[1], [0], [0], [1], [0, 0, 1, 1], [], []>} : vector<8x32xbf16>, vector<32x128xbf16>, vector<8x128xf32> -> vector<8x128xf32>
    %236 = arith.addf %233, %235 : vector<8x128xf32>
    %237 = arith.negf %236 : vector<8x128xf32>
    %238 = math.exp %237 : vector<8x128xf32>
    %cst_80 = arith.constant 1.000000e+00 : f32
    %239 = vector.broadcast %cst_80 : f32 to vector<8x128xf32>
    %240 = arith.addf %239, %238 : vector<8x128xf32>
    %241 = arith.divf %239, %240 : vector<8x128xf32>
    %242 = math.tanh %236 : vector<8x128xf32>
    %243 = vector.extract_strided_slice %241 {offsets = [0, 0], sizes = [8, 32], strides = [1, 1]} : vector<8x128xf32> to vector<8x32xf32>
    %244 = vector.extract_strided_slice %241 {offsets = [0, 32], sizes = [8, 32], strides = [1, 1]} : vector<8x128xf32> to vector<8x32xf32>
    %245 = vector.extract_strided_slice %242 {offsets = [0, 64], sizes = [8, 32], strides = [1, 1]} : vector<8x128xf32> to vector<8x32xf32>
    %246 = vector.extract_strided_slice %241 {offsets = [0, 96], sizes = [8, 32], strides = [1, 1]} : vector<8x128xf32> to vector<8x32xf32>
    %247 = arith.mulf %244, %224 : vector<8x32xf32>
    %248 = arith.mulf %243, %245 : vector<8x32xf32>
    %249 = arith.addf %247, %248 : vector<8x32xf32>
    %250 = math.tanh %249 : vector<8x32xf32>
    %251 = arith.mulf %246, %250 : vector<8x32xf32>
    %252 = arith.truncf %251 : vector<8x32xf32> to vector<8x32xbf16>
    %c0_i32_81 = arith.constant 0 : i32
    %253 = arith.addi %c0_i32_81, %231 : i32
    %254 = arith.index_cast %253 : i32 to index
    %c0_82 = arith.constant 0 : index
    %255 = vector.load %arg9[%254, %c0_82] : memref<64x32xbf16, #tpu.memory_space<vmem>>, vector<8x32xbf16>
    tpu.vector_store %arg9[%254, %c0_82], %252 {strides = array<i32>} : memref<64x32xbf16, #tpu.memory_space<vmem>>, vector<8x32xbf16>,
    %c1_i32_83 = arith.constant 1 : i32
    %c8_i32_84 = arith.constant 8 : i32
    %256 = arith.muli %c1_i32_83, %c8_i32_84 : i32
    %257 = tpu.assume_multiple %256, 8 : i32
    %258 = arith.index_cast %257 : i32 to index
    %c0_85 = arith.constant 0 : index
    %259 = vector.load %arg10[%258, %c0_85] : memref<64x128xf32, #tpu.memory_space<vmem>>, vector<8x128xf32>
    %260 = arith.truncf %251 : vector<8x32xf32> to vector<8x32xbf16>
    %cst_86 = arith.constant dense<0.000000e+00> : vector<8x128xf32>
    %261 = tpu.matmul %260, %221, %cst_86 {dimension_numbers = #tpu.dot_dimension_numbers<[1], [0], [0], [1], [0, 0, 1, 1], [], []>} : vector<8x32xbf16>, vector<32x128xbf16>, vector<8x128xf32> -> vector<8x128xf32>
    %262 = arith.addf %259, %261 : vector<8x128xf32>
    %263 = arith.negf %262 : vector<8x128xf32>
    %264 = math.exp %263 : vector<8x128xf32>
    %cst_87 = arith.constant 1.000000e+00 : f32
    %265 = vector.broadcast %cst_87 : f32 to vector<8x128xf32>
    %266 = arith.addf %265, %264 : vector<8x128xf32>
    %267 = arith.divf %265, %266 : vector<8x128xf32>
    %268 = math.tanh %262 : vector<8x128xf32>
    %269 = vector.extract_strided_slice %267 {offsets = [0, 0], sizes = [8, 32], strides = [1, 1]} : vector<8x128xf32> to vector<8x32xf32>
    %270 = vector.extract_strided_slice %267 {offsets = [0, 32], sizes = [8, 32], strides = [1, 1]} : vector<8x128xf32> to vector<8x32xf32>
    %271 = vector.extract_strided_slice %268 {offsets = [0, 64], sizes = [8, 32], strides = [1, 1]} : vector<8x128xf32> to vector<8x32xf32>
    %272 = vector.extract_strided_slice %267 {offsets = [0, 96], sizes = [8, 32], strides = [1, 1]} : vector<8x128xf32> to vector<8x32xf32>
    %273 = arith.mulf %270, %249 : vector<8x32xf32>
    %274 = arith.mulf %269, %271 : vector<8x32xf32>
    %275 = arith.addf %273, %274 : vector<8x32xf32>
    %276 = math.tanh %275 : vector<8x32xf32>
    %277 = arith.mulf %272, %276 : vector<8x32xf32>
    %278 = arith.truncf %277 : vector<8x32xf32> to vector<8x32xbf16>
    %c0_i32_88 = arith.constant 0 : i32
    %279 = arith.addi %c0_i32_88, %257 : i32
    %280 = arith.index_cast %279 : i32 to index
    %c0_89 = arith.constant 0 : index
    %281 = vector.load %arg9[%280, %c0_89] : memref<64x32xbf16, #tpu.memory_space<vmem>>, vector<8x32xbf16>
    tpu.vector_store %arg9[%280, %c0_89], %278 {strides = array<i32>} : memref<64x32xbf16, #tpu.memory_space<vmem>>, vector<8x32xbf16>,
    %c2_i32_90 = arith.constant 2 : i32
    %c8_i32_91 = arith.constant 8 : i32
    %282 = arith.muli %c2_i32_90, %c8_i32_91 : i32
    %283 = tpu.assume_multiple %282, 8 : i32
    %284 = arith.index_cast %283 : i32 to index
    %c0_92 = arith.constant 0 : index
    %285 = vector.load %arg10[%284, %c0_92] : memref<64x128xf32, #tpu.memory_space<vmem>>, vector<8x128xf32>
    %286 = arith.truncf %277 : vector<8x32xf32> to vector<8x32xbf16>
    %cst_93 = arith.constant dense<0.000000e+00> : vector<8x128xf32>
    %287 = tpu.matmul %286, %221, %cst_93 {dimension_numbers = #tpu.dot_dimension_numbers<[1], [0], [0], [1], [0, 0, 1, 1], [], []>} : vector<8x32xbf16>, vector<32x128xbf16>, vector<8x128xf32> -> vector<8x128xf32>
    %288 = arith.addf %285, %287 : vector<8x128xf32>
    %289 = arith.negf %288 : vector<8x128xf32>
    %290 = math.exp %289 : vector<8x128xf32>
    %cst_94 = arith.constant 1.000000e+00 : f32
    %291 = vector.broadcast %cst_94 : f32 to vector<8x128xf32>
    %292 = arith.addf %291, %290 : vector<8x128xf32>
    %293 = arith.divf %291, %292 : vector<8x128xf32>
    %294 = math.tanh %288 : vector<8x128xf32>
    %295 = vector.extract_strided_slice %293 {offsets = [0, 0], sizes = [8, 32], strides = [1, 1]} : vector<8x128xf32> to vector<8x32xf32>
    %296 = vector.extract_strided_slice %293 {offsets = [0, 32], sizes = [8, 32], strides = [1, 1]} : vector<8x128xf32> to vector<8x32xf32>
    %297 = vector.extract_strided_slice %294 {offsets = [0, 64], sizes = [8, 32], strides = [1, 1]} : vector<8x128xf32> to vector<8x32xf32>
    %298 = vector.extract_strided_slice %293 {offsets = [0, 96], sizes = [8, 32], strides = [1, 1]} : vector<8x128xf32> to vector<8x32xf32>
    %299 = arith.mulf %296, %275 : vector<8x32xf32>
    %300 = arith.mulf %295, %297 : vector<8x32xf32>
    %301 = arith.addf %299, %300 : vector<8x32xf32>
    %302 = math.tanh %301 : vector<8x32xf32>
    %303 = arith.mulf %298, %302 : vector<8x32xf32>
    %304 = arith.truncf %303 : vector<8x32xf32> to vector<8x32xbf16>
    %c0_i32_95 = arith.constant 0 : i32
    %305 = arith.addi %c0_i32_95, %283 : i32
    %306 = arith.index_cast %305 : i32 to index
    %c0_96 = arith.constant 0 : index
    %307 = vector.load %arg9[%306, %c0_96] : memref<64x32xbf16, #tpu.memory_space<vmem>>, vector<8x32xbf16>
    tpu.vector_store %arg9[%306, %c0_96], %304 {strides = array<i32>} : memref<64x32xbf16, #tpu.memory_space<vmem>>, vector<8x32xbf16>,
    %c3_i32_97 = arith.constant 3 : i32
    %c8_i32_98 = arith.constant 8 : i32
    %308 = arith.muli %c3_i32_97, %c8_i32_98 : i32
    %309 = tpu.assume_multiple %308, 8 : i32
    %310 = arith.index_cast %309 : i32 to index
    %c0_99 = arith.constant 0 : index
    %311 = vector.load %arg10[%310, %c0_99] : memref<64x128xf32, #tpu.memory_space<vmem>>, vector<8x128xf32>
    %312 = arith.truncf %303 : vector<8x32xf32> to vector<8x32xbf16>
    %cst_100 = arith.constant dense<0.000000e+00> : vector<8x128xf32>
    %313 = tpu.matmul %312, %221, %cst_100 {dimension_numbers = #tpu.dot_dimension_numbers<[1], [0], [0], [1], [0, 0, 1, 1], [], []>} : vector<8x32xbf16>, vector<32x128xbf16>, vector<8x128xf32> -> vector<8x128xf32>
    %314 = arith.addf %311, %313 : vector<8x128xf32>
    %315 = arith.negf %314 : vector<8x128xf32>
    %316 = math.exp %315 : vector<8x128xf32>
    %cst_101 = arith.constant 1.000000e+00 : f32
    %317 = vector.broadcast %cst_101 : f32 to vector<8x128xf32>
    %318 = arith.addf %317, %316 : vector<8x128xf32>
    %319 = arith.divf %317, %318 : vector<8x128xf32>
    %320 = math.tanh %314 : vector<8x128xf32>
    %321 = vector.extract_strided_slice %319 {offsets = [0, 0], sizes = [8, 32], strides = [1, 1]} : vector<8x128xf32> to vector<8x32xf32>
    %322 = vector.extract_strided_slice %319 {offsets = [0, 32], sizes = [8, 32], strides = [1, 1]} : vector<8x128xf32> to vector<8x32xf32>
    %323 = vector.extract_strided_slice %320 {offsets = [0, 64], sizes = [8, 32], strides = [1, 1]} : vector<8x128xf32> to vector<8x32xf32>
    %324 = vector.extract_strided_slice %319 {offsets = [0, 96], sizes = [8, 32], strides = [1, 1]} : vector<8x128xf32> to vector<8x32xf32>
    %325 = arith.mulf %322, %301 : vector<8x32xf32>
    %326 = arith.mulf %321, %323 : vector<8x32xf32>
    %327 = arith.addf %325, %326 : vector<8x32xf32>
    %328 = math.tanh %327 : vector<8x32xf32>
    %329 = arith.mulf %324, %328 : vector<8x32xf32>
    %330 = arith.truncf %329 : vector<8x32xf32> to vector<8x32xbf16>
    %c0_i32_102 = arith.constant 0 : i32
    %331 = arith.addi %c0_i32_102, %309 : i32
    %332 = arith.index_cast %331 : i32 to index
    %c0_103 = arith.constant 0 : index
    %333 = vector.load %arg9[%332, %c0_103] : memref<64x32xbf16, #tpu.memory_space<vmem>>, vector<8x32xbf16>
    tpu.vector_store %arg9[%332, %c0_103], %330 {strides = array<i32>} : memref<64x32xbf16, #tpu.memory_space<vmem>>, vector<8x32xbf16>,
    %c4_i32_104 = arith.constant 4 : i32
    %c8_i32_105 = arith.constant 8 : i32
    %334 = arith.muli %c4_i32_104, %c8_i32_105 : i32
    %335 = tpu.assume_multiple %334, 8 : i32
    %336 = arith.index_cast %335 : i32 to index
    %c0_106 = arith.constant 0 : index
    %337 = vector.load %arg10[%336, %c0_106] : memref<64x128xf32, #tpu.memory_space<vmem>>, vector<8x128xf32>
    %338 = arith.truncf %329 : vector<8x32xf32> to vector<8x32xbf16>
    %cst_107 = arith.constant dense<0.000000e+00> : vector<8x128xf32>
    %339 = tpu.matmul %338, %221, %cst_107 {dimension_numbers = #tpu.dot_dimension_numbers<[1], [0], [0], [1], [0, 0, 1, 1], [], []>} : vector<8x32xbf16>, vector<32x128xbf16>, vector<8x128xf32> -> vector<8x128xf32>
    %340 = arith.addf %337, %339 : vector<8x128xf32>
    %341 = arith.negf %340 : vector<8x128xf32>
    %342 = math.exp %341 : vector<8x128xf32>
    %cst_108 = arith.constant 1.000000e+00 : f32
    %343 = vector.broadcast %cst_108 : f32 to vector<8x128xf32>
    %344 = arith.addf %343, %342 : vector<8x128xf32>
    %345 = arith.divf %343, %344 : vector<8x128xf32>
    %346 = math.tanh %340 : vector<8x128xf32>
    %347 = vector.extract_strided_slice %345 {offsets = [0, 0], sizes = [8, 32], strides = [1, 1]} : vector<8x128xf32> to vector<8x32xf32>
    %348 = vector.extract_strided_slice %345 {offsets = [0, 32], sizes = [8, 32], strides = [1, 1]} : vector<8x128xf32> to vector<8x32xf32>
    %349 = vector.extract_strided_slice %346 {offsets = [0, 64], sizes = [8, 32], strides = [1, 1]} : vector<8x128xf32> to vector<8x32xf32>
    %350 = vector.extract_strided_slice %345 {offsets = [0, 96], sizes = [8, 32], strides = [1, 1]} : vector<8x128xf32> to vector<8x32xf32>
    %351 = arith.mulf %348, %327 : vector<8x32xf32>
    %352 = arith.mulf %347, %349 : vector<8x32xf32>
    %353 = arith.addf %351, %352 : vector<8x32xf32>
    %354 = math.tanh %353 : vector<8x32xf32>
    %355 = arith.mulf %350, %354 : vector<8x32xf32>
    %356 = arith.truncf %355 : vector<8x32xf32> to vector<8x32xbf16>
    %c0_i32_109 = arith.constant 0 : i32
    %357 = arith.addi %c0_i32_109, %335 : i32
    %358 = arith.index_cast %357 : i32 to index
    %c0_110 = arith.constant 0 : index
    %359 = vector.load %arg9[%358, %c0_110] : memref<64x32xbf16, #tpu.memory_space<vmem>>, vector<8x32xbf16>
    tpu.vector_store %arg9[%358, %c0_110], %356 {strides = array<i32>} : memref<64x32xbf16, #tpu.memory_space<vmem>>, vector<8x32xbf16>,
    %c5_i32_111 = arith.constant 5 : i32
    %c8_i32_112 = arith.constant 8 : i32
    %360 = arith.muli %c5_i32_111, %c8_i32_112 : i32
    %361 = tpu.assume_multiple %360, 8 : i32
    %362 = arith.index_cast %361 : i32 to index
    %c0_113 = arith.constant 0 : index
    %363 = vector.load %arg10[%362, %c0_113] : memref<64x128xf32, #tpu.memory_space<vmem>>, vector<8x128xf32>
    %364 = arith.truncf %355 : vector<8x32xf32> to vector<8x32xbf16>
    %cst_114 = arith.constant dense<0.000000e+00> : vector<8x128xf32>
    %365 = tpu.matmul %364, %221, %cst_114 {dimension_numbers = #tpu.dot_dimension_numbers<[1], [0], [0], [1], [0, 0, 1, 1], [], []>} : vector<8x32xbf16>, vector<32x128xbf16>, vector<8x128xf32> -> vector<8x128xf32>
    %366 = arith.addf %363, %365 : vector<8x128xf32>
    %367 = arith.negf %366 : vector<8x128xf32>
    %368 = math.exp %367 : vector<8x128xf32>
    %cst_115 = arith.constant 1.000000e+00 : f32
    %369 = vector.broadcast %cst_115 : f32 to vector<8x128xf32>
    %370 = arith.addf %369, %368 : vector<8x128xf32>
    %371 = arith.divf %369, %370 : vector<8x128xf32>
    %372 = math.tanh %366 : vector<8x128xf32>
    %373 = vector.extract_strided_slice %371 {offsets = [0, 0], sizes = [8, 32], strides = [1, 1]} : vector<8x128xf32> to vector<8x32xf32>
    %374 = vector.extract_strided_slice %371 {offsets = [0, 32], sizes = [8, 32], strides = [1, 1]} : vector<8x128xf32> to vector<8x32xf32>
    %375 = vector.extract_strided_slice %372 {offsets = [0, 64], sizes = [8, 32], strides = [1, 1]} : vector<8x128xf32> to vector<8x32xf32>
    %376 = vector.extract_strided_slice %371 {offsets = [0, 96], sizes = [8, 32], strides = [1, 1]} : vector<8x128xf32> to vector<8x32xf32>
    %377 = arith.mulf %374, %353 : vector<8x32xf32>
    %378 = arith.mulf %373, %375 : vector<8x32xf32>
    %379 = arith.addf %377, %378 : vector<8x32xf32>
    %380 = math.tanh %379 : vector<8x32xf32>
    %381 = arith.mulf %376, %380 : vector<8x32xf32>
    %382 = arith.truncf %381 : vector<8x32xf32> to vector<8x32xbf16>
    %c0_i32_116 = arith.constant 0 : i32
    %383 = arith.addi %c0_i32_116, %361 : i32
    %384 = arith.index_cast %383 : i32 to index
    %c0_117 = arith.constant 0 : index
    %385 = vector.load %arg9[%384, %c0_117] : memref<64x32xbf16, #tpu.memory_space<vmem>>, vector<8x32xbf16>
    tpu.vector_store %arg9[%384, %c0_117], %382 {strides = array<i32>} : memref<64x32xbf16, #tpu.memory_space<vmem>>, vector<8x32xbf16>,
    %c6_i32_118 = arith.constant 6 : i32
    %c8_i32_119 = arith.constant 8 : i32
    %386 = arith.muli %c6_i32_118, %c8_i32_119 : i32
    %387 = tpu.assume_multiple %386, 8 : i32
    %388 = arith.index_cast %387 : i32 to index
    %c0_120 = arith.constant 0 : index
    %389 = vector.load %arg10[%388, %c0_120] : memref<64x128xf32, #tpu.memory_space<vmem>>, vector<8x128xf32>
    %390 = arith.truncf %381 : vector<8x32xf32> to vector<8x32xbf16>
    %cst_121 = arith.constant dense<0.000000e+00> : vector<8x128xf32>
    %391 = tpu.matmul %390, %221, %cst_121 {dimension_numbers = #tpu.dot_dimension_numbers<[1], [0], [0], [1], [0, 0, 1, 1], [], []>} : vector<8x32xbf16>, vector<32x128xbf16>, vector<8x128xf32> -> vector<8x128xf32>
    %392 = arith.addf %389, %391 : vector<8x128xf32>
    %393 = arith.negf %392 : vector<8x128xf32>
    %394 = math.exp %393 : vector<8x128xf32>
    %cst_122 = arith.constant 1.000000e+00 : f32
    %395 = vector.broadcast %cst_122 : f32 to vector<8x128xf32>
    %396 = arith.addf %395, %394 : vector<8x128xf32>
    %397 = arith.divf %395, %396 : vector<8x128xf32>
    %398 = math.tanh %392 : vector<8x128xf32>
    %399 = vector.extract_strided_slice %397 {offsets = [0, 0], sizes = [8, 32], strides = [1, 1]} : vector<8x128xf32> to vector<8x32xf32>
    %400 = vector.extract_strided_slice %397 {offsets = [0, 32], sizes = [8, 32], strides = [1, 1]} : vector<8x128xf32> to vector<8x32xf32>
    %401 = vector.extract_strided_slice %398 {offsets = [0, 64], sizes = [8, 32], strides = [1, 1]} : vector<8x128xf32> to vector<8x32xf32>
    %402 = vector.extract_strided_slice %397 {offsets = [0, 96], sizes = [8, 32], strides = [1, 1]} : vector<8x128xf32> to vector<8x32xf32>
    %403 = arith.mulf %400, %379 : vector<8x32xf32>
    %404 = arith.mulf %399, %401 : vector<8x32xf32>
    %405 = arith.addf %403, %404 : vector<8x32xf32>
    %406 = math.tanh %405 : vector<8x32xf32>
    %407 = arith.mulf %402, %406 : vector<8x32xf32>
    %408 = arith.truncf %407 : vector<8x32xf32> to vector<8x32xbf16>
    %c0_i32_123 = arith.constant 0 : i32
    %409 = arith.addi %c0_i32_123, %387 : i32
    %410 = arith.index_cast %409 : i32 to index
    %c0_124 = arith.constant 0 : index
    %411 = vector.load %arg9[%410, %c0_124] : memref<64x32xbf16, #tpu.memory_space<vmem>>, vector<8x32xbf16>
    tpu.vector_store %arg9[%410, %c0_124], %408 {strides = array<i32>} : memref<64x32xbf16, #tpu.memory_space<vmem>>, vector<8x32xbf16>,
    %c7_i32_125 = arith.constant 7 : i32
    %c8_i32_126 = arith.constant 8 : i32
    %412 = arith.muli %c7_i32_125, %c8_i32_126 : i32
    %413 = tpu.assume_multiple %412, 8 : i32
    %414 = arith.index_cast %413 : i32 to index
    %c0_127 = arith.constant 0 : index
    %415 = vector.load %arg10[%414, %c0_127] : memref<64x128xf32, #tpu.memory_space<vmem>>, vector<8x128xf32>
    %416 = arith.truncf %407 : vector<8x32xf32> to vector<8x32xbf16>
    %cst_128 = arith.constant dense<0.000000e+00> : vector<8x128xf32>
    %417 = tpu.matmul %416, %221, %cst_128 {dimension_numbers = #tpu.dot_dimension_numbers<[1], [0], [0], [1], [0, 0, 1, 1], [], []>} : vector<8x32xbf16>, vector<32x128xbf16>, vector<8x128xf32> -> vector<8x128xf32>
    %418 = arith.addf %415, %417 : vector<8x128xf32>
    %419 = arith.negf %418 : vector<8x128xf32>
    %420 = math.exp %419 : vector<8x128xf32>
    %cst_129 = arith.constant 1.000000e+00 : f32
    %421 = vector.broadcast %cst_129 : f32 to vector<8x128xf32>
    %422 = arith.addf %421, %420 : vector<8x128xf32>
    %423 = arith.divf %421, %422 : vector<8x128xf32>
    %424 = math.tanh %418 : vector<8x128xf32>
    %425 = vector.extract_strided_slice %423 {offsets = [0, 0], sizes = [8, 32], strides = [1, 1]} : vector<8x128xf32> to vector<8x32xf32>
    %426 = vector.extract_strided_slice %423 {offsets = [0, 32], sizes = [8, 32], strides = [1, 1]} : vector<8x128xf32> to vector<8x32xf32>
    %427 = vector.extract_strided_slice %424 {offsets = [0, 64], sizes = [8, 32], strides = [1, 1]} : vector<8x128xf32> to vector<8x32xf32>
    %428 = vector.extract_strided_slice %423 {offsets = [0, 96], sizes = [8, 32], strides = [1, 1]} : vector<8x128xf32> to vector<8x32xf32>
    %429 = arith.mulf %426, %405 : vector<8x32xf32>
    %430 = arith.mulf %425, %427 : vector<8x32xf32>
    %431 = arith.addf %429, %430 : vector<8x32xf32>
    %432 = math.tanh %431 : vector<8x32xf32>
    %433 = arith.mulf %428, %432 : vector<8x32xf32>
    %434 = arith.truncf %433 : vector<8x32xf32> to vector<8x32xbf16>
    %c0_i32_130 = arith.constant 0 : i32
    %435 = arith.addi %c0_i32_130, %413 : i32
    %436 = arith.index_cast %435 : i32 to index
    %c0_131 = arith.constant 0 : index
    %437 = vector.load %arg9[%436, %c0_131] : memref<64x32xbf16, #tpu.memory_space<vmem>>, vector<8x32xbf16>
    tpu.vector_store %arg9[%436, %c0_131], %434 {strides = array<i32>} : memref<64x32xbf16, #tpu.memory_space<vmem>>, vector<8x32xbf16>,
    %c8_i32_132 = arith.constant 8 : i32
    %c8 = arith.constant 8 : index
    %c0_133 = arith.constant 0 : index
    %438 = vector.load %arg7[%c8, %c0_133] : memref<16x32xf32, #tpu.memory_space<vmem>>, vector<8x32xf32>
    tpu.vector_store %arg7[%c8, %c0_133], %433 {strides = array<i32>} : memref<16x32xf32, #tpu.memory_space<vmem>>, vector<8x32xf32>,
    %c8_134 = arith.constant 8 : index
    %c0_135 = arith.constant 0 : index
    %439 = vector.load %arg8[%c8_134, %c0_135] : memref<16x32xf32, #tpu.memory_space<vmem>>, vector<8x32xf32>
    tpu.vector_store %arg8[%c8_134, %c0_135], %431 {strides = array<i32>} : memref<16x32xf32, #tpu.memory_space<vmem>>, vector<8x32xf32>,
    return
  }
}

</mosaic_0001>

<bundles_post_ra>
// kernel: tpu_custom_call.1
= control target key start
LH: loop header
LB: loop body
LE: loop exit
PB: predicated region body
PF: predicated region fallthrough
CT: control target
= control target key end

     0   :  { %14 = vsyncpa [#allocation5], 0  ;;  %s2650_s0 = inlined_call_operand.vmem [shape: bf16[64,32], index: 0, kind: input, shape index: {}]   ;;  %s2651_s1 = inlined_call_operand.vmem [shape: bf16[32,128], index: 1, kind: input, shape index: {}]   ;;  %s2652_s2 = inlined_call_operand.vmem [shape: bf16[32,128], index: 2, kind: input, shape index: {}]   ;;  %s2653_s3 = inlined_call_operand.vmem [shape: f32[1,128], index: 3, kind: input, shape index: {}]   ;;  %s2654_s4 = inlined_call_operand.vmem [shape: bf16[32,128], index: 4, kind: input, shape index: {}]   ;;  %s2655_s5 = inlined_call_operand.hbm [shape: bf16[32,128], index: 5, kind: input, shape index: {}]   ;;  %s2656_s6 = inlined_call_operand.vmem [shape: f32[1,128], index: 6, kind: input, shape index: {}]   ;;  %s2657_s7 = inlined_call_operand.hbm [shape: f32[16,32], index: 7, kind: output, shape index: {0}]   ;;  %s2658_s8 = inlined_call_operand.hbm [shape: f32[16,32], index: 8, kind: output, shape index: {1}]  }
   0x1   :  { %15 = vsyncpa [#allocation6], 0 }
   0x2   :  { %16 = vsyncpa [#allocation9], 0  ;;  %s2197_s27 = smov [#allocation4]  }
   0x3   :  { %s32_s28 = sshll.u32 %s2197_s27, 4  ;;  %s33_s28 = int_to_ptr.vmem [resolvable:$true] %s32_s28 }
   0x4   :  { %s2139_s29 = scalar_lea.vmem %s33_s28, 256  ;;  %p2144_p1 = scmp.lt.s32.totalorder %s33_s28, %s33_s28 }
   0x5   :  { %p2140_p0 = scmp.ne.s32.totalorder %s33_s28, %s2139_s29  ;;  %p2145_p2 = scmp.lt.s32.totalorder %s2139_s29, %s2139_s29 }
   0x7   :  { %p2146_p3 = por %p2145_p2, %p2144_p1 }
   0x9   :  { %p2147_p4 = pnand %p2146_p3, %p2140_p0 }
   0xb   :  { %2150 = shalt.err (!%p2147_p4)
}
   0xc   :  { %s2198_s30 = smov 64   ;;  %s2199_s9 = smov 4  }
   0xd   :  { %38 = dma.hbm_to_vmem [thread:$0]  %s2655_s5, 256, %s33_s28, [#allocation5], %s2198_s30, %s2198_s30, %s2199_s9  }
   0xe   :  { %2191 = dma.done.wait [#allocation5], 256  }
   0xf   :  { %2192 = vsyncadd [#allocation5], 4294967040  ;;  %v2200_v0 = vmov 0.0   ;;  %vm2201_vm0 = vmmov 0   ;;  %v1987_v1 = vld [vmem:[%s2651_s1 + $0x8] sm:$0xff]   ;;  %v1989_v3 = vld [vmem:[%s2651_s1] sm:$0xff]  }
  0x10   :  { %1835 = vmatprep.subr.bf16.mxu1 %v2200_v0  ;;  %1839 = vmatprep.mubr.msk.bf16.mxu1 %vm2201_vm0, %v2200_v0  ;;  %v2268_v2 = vld [vmem:[%s2652_s2 + $0x8] sm:$0xff]   ;;  %v2277_v4 = vld [vmem:[%s2652_s2] sm:$0xff]   ;;  %vm100_vm1 = vcmask 261120   ;;  %v2202_v7 = vmov 0   ;;  %v1993_v50 = vld [vmem:[%s2650_s0 + $0x10] sm:$0xff]   ;;  %vm274_vm2 = vcmask 257024  }
  0x11   :  { %1823 = vmatprep.subr.bf16.mxu0 %v1987_v1  ;;  %1836 = vmatpush3.bf16.msra.mxu1 %v2268_v2  ;;  %v1991_v5 = vld [vmem:[%s2650_s0] sm:$0xff]   ;;  %v1992_v6 = vld [vmem:[%s2650_s0 + $0x8] sm:$0xff]   ;;  %v1994_v51 = vld [vmem:[%s2650_s0 + $0x18] sm:$0xff]  }
  0x12   :  { %1824 = vmatpush3.bf16.msra.mxu0 %v1987_v1  ;;  %1837 = vmatprep.subr.bf16.mxu1 %v2200_v0  ;;  %v2307_v10 = vld [vmem:[%s2653_s3] ss:$0 sm:$0xff]  ;;  %s2203_s3 = smov 32  }
  0x13   :  { %1825 = vmatprep.subr.bf16.mxu0 %v1989_v3  ;;  %1827 = vmatprep.mubr.msk.bf16.mxu0 %vm100_vm1, %v1991_v5 }
  0x15   :  { %1838 = vmatpush3.bf16.msra.mxu1 %v2277_v4 }
  0x16   :  { %1826 = vmatpush3.bf16.msra.mxu0 %v1989_v3  ;;  %1843 = vmatprep.subr.bf16.mxu1 %v2200_v0 }
  0x17   :  { %1851 = vmatprep.subr.bf16.mxu0 %v2200_v0 }
  0x18   :  { %1840 = vmatmul.mubr.bf16.vlgmr.msra.gmra.mxu1 %v2202_v7 }
  0x19   :  { %1828 = vmatmul.mubr.msk.bf16.vlgmr.msra.gmra.mxu0 %vm100_vm1, %v1992_v6  ;;  %1844 = vmatpush3.bf16.msra.mxu1 %v2268_v2 }
  0x1a   :  { %1847 = vmatprep.mubr.msk.bf16.mxu1 %vm2201_vm0, %v2200_v0  ;;  %1845 = vmatprep.subr.bf16.mxu1 %v2200_v0 }
  0x1b   :  { %1852 = vmatpush3.bf16.msra.mxu0 %v2268_v2  ;;  %1831 = vmatprep.mubr.msk.bf16.mxu0 %vm100_vm1, %v1993_v50 }
  0x1c   :  { %1853 = vmatprep.subr.bf16.mxu0 %v2200_v0 }
  0x1d   :  { %1846 = vmatpush3.bf16.msra.mxu1 %v2277_v4 }
  0x1e   :  { %1859 = vmatprep.subr.bf16.mxu1 %v2200_v0 }
  0x1f   :  { %1854 = vmatpush3.bf16.msra.mxu0 %v2277_v4 }
  0x20   :  { %1867 = vmatprep.subr.bf16.mxu0 %v2200_v0 }
  0x21   :  { %1832 = vmatmul.mubr.msk.bf16.gmra.mxu0 %vm100_vm1, %v1994_v51 }
  0x22   :  { %1855 = vmatprep.mubr.msk.bf16.mxu0 %vm2201_vm0, %v2200_v0 }
  0xd8   :  { %v236_v8 = vpop.f32.mrf.mxu1 }
  0xd9   :  { %v2302_v9 = vpop.f32.mrf.mxu0 }
  0xda   :  { %v1841_v11 = vpop.f32.mrf.mxu1  ;;  %v156_v61 = vadd.f32 %v2302_v9, %v2307_v10 }
  0xdb   :  { %v147_v12 = vpop.f32.mrf.mxu0 }
  0xdc   :  { %v148_v13 = vadd.f32 %v2307_v10, %v147_v12  ;;  %v239_v14 = vpop.f32.mrf.mxu1 }
  0xdd   :  { %v2324_v32 = vpop.f32.mrf.mxu0 }
  0xde   :  { %v242_v15 = vadd.f32 %v236_v8, %v148_v13  ;;  %v1842_v16 = vpop.f32.mrf.mxu1 }
  0xdf   :  { %v150_v33 = vpop.f32.mrf.mxu0 }
  0xe0   :  { %2003 = vtanh.f32 %v242_v15  ;;  %v1688_v18 = vmul.f32 -1.442695, %v242_v15  ;;  %v151_v34 = vadd.f32 %v2307_v10, %v150_v33 }
  0xe1   :  { %v2351_v57 = vpop.f32.mrf.mxu0 }
  0xe2   :  { %2005 = vpow2.f32 %v1688_v18 }
  0xe3   :  { %v2353_v58 = vpop.f32.mrf.mxu0 }
  0xe5   :  { %v2355_v59 = vpop.f32.mrf.mxu0 }
  0xe7   :  { %v2357_v60 = vpop.f32.mrf.mxu0 }
  0xed   :  { %v2004_v17 = vpop.eup %2003 }
  0xee   :  { %252 = vrot.lane.b32.xlu0 %v2004_v17, %s2198_s30 }
  0xef   :  { %v2006_v19 = vpop.eup %2005 }
  0xf0   :  { %v246_v20 = vadd.f32 1.0, %v2006_v19 }
  0xf2   :  { %2007 = vrcp.f32 %v246_v20 }
  0xff   :  { %v2008_v21 = vpop.eup %2007 }
 0x100   :  { %v250_v24 = vmul.f32 0.0, %v2008_v21 }
 0x160   :  { %v253_v22 = vpop.permute.xlu0 %252 }
 0x161   :  { %v255_v23 = vmul.f32 %v2008_v21, %v253_v22 }
 0x163   :  { %257 = vrot.lane.b32.xlu0 %v255_v23, %s2203_s3  ;;  %v159_v23 = vadd.f32 %v2324_v32, %v2307_v10 }
 0x1d5   :  { %v258_v25 = vpop.permute.xlu0 %257 }
 0x1d6   :  { %v260_v26 = vadd.f32 %v258_v25, %v250_v24 }
 0x1d8   :  { %2009 = vtanh.f32 %v260_v26 }
 0x1e5   :  { %v2010_v27 = vpop.eup %2009 }
 0x1e6   :  { %263 = vrot.lane.b32.xlu1 %v2010_v27, %s2198_s30 }
 0x258   :  { %v264_v28 = vpop.permute.xlu1 %263 }
 0x259   :  { %v266_v29 = vmul.f32 %v2008_v21, %v264_v28 }
 0x25b   :  { %v2313_v30 = vpack.c.bf16 %v266_v29, %v266_v29 }
 0x25d   :  { %278 = vrot.lane.b32.xlu1 %v2313_v30, %s2203_s3 }
 0x2cf   :  { %v279_v31 = vpop.permute.xlu1 %278 }
 0x2d0   :  { %1848 = vmatmul.mubr.msk.bf16.vlgmr.msra.gmra.mxu1 %vm100_vm1, %v279_v31 }
 0x2d1   :  { %1860 = vmatpush3.bf16.msra.mxu1 %v2268_v2  ;;  %1863 = vmatprep.mubr.msk.bf16.mxu1 %vm2201_vm0, %v2200_v0 }
 0x2d2   :  { %1861 = vmatprep.subr.bf16.mxu1 %v2200_v0 }
 0x2d5   :  { %1862 = vmatpush3.bf16.msra.mxu1 %v2277_v4 }
 0x2d6   :  { %1875 = vmatprep.subr.bf16.mxu1 %v2200_v0 }
 0x390   :  { %v317_v35 = vpop.f32.mrf.mxu1 }
 0x391   :  { %v323_v36 = vadd.f32 %v317_v35, %v151_v34 }
 0x392   :  { %v1849_v37 = vpop.f32.mrf.mxu1 }
 0x393   :  { %2011 = vtanh.f32 %v323_v36  ;;  %v1691_v41 = vmul.f32 -1.442695, %v323_v36 }
 0x394   :  { %v320_v38 = vpop.f32.mrf.mxu1 }
 0x395   :  { %2013 = vpow2.f32 %v1691_v41 }
 0x396   :  { %v1850_v39 = vpop.f32.mrf.mxu1 }
 0x3a0   :  { %v2012_v40 = vpop.eup %2011 }
 0x3a1   :  { %333 = vrot.lane.b32.xlu0 %v2012_v40, %s2198_s30 }
 0x3a2   :  { %v2014_v42 = vpop.eup %2013 }
 0x3a3   :  { %v327_v43 = vadd.f32 1.0, %v2014_v42 }
 0x3a5   :  { %2015 = vrcp.f32 %v327_v43 }
 0x3b2   :  { %v2016_v44 = vpop.eup %2015 }
 0x3b3   :  { %v331_v47 = vmul.f32 %v2016_v44, %v260_v26 }
 0x413   :  { %v334_v45 = vpop.permute.xlu0 %333 }
 0x414   :  { %v336_v46 = vmul.f32 %v2016_v44, %v334_v45  ;;  %v164_v45 = vadd.f32 %v2307_v10, %v2353_v58 }
 0x416   :  { %338 = vrot.lane.b32.xlu1 %v336_v46, %s2203_s3 }
 0x488   :  { %v339_v48 = vpop.permute.xlu1 %338 }
 0x489   :  { %v341_v49 = vadd.f32 %v339_v48, %v331_v47 }
 0x48b   :  { %2017 = vtanh.f32 %v341_v49 }
 0x498   :  { %v2018_v52 = vpop.eup %2017 }
 0x499   :  { %344 = vrot.lane.b32.xlu0 %v2018_v52, %s2198_s30 }
 0x50b   :  { %v345_v53 = vpop.permute.xlu0 %344 }
 0x50c   :  { %v347_v54 = vmul.f32 %v2016_v44, %v345_v53 }
 0x50e   :  { %v2340_v55 = vpack.c.bf16 %v347_v54, %v347_v54 }
 0x510   :  { %359 = vrot.lane.b32.xlu1 %v2340_v55, %s2203_s3 }
 0x582   :  { %v360_v56 = vpop.permute.xlu1 %359 }
 0x583   :  { %1856 = vmatmul.mubr.msk.bf16.vlgmr.msra.gmra.mxu0 %vm100_vm1, %v360_v56 }
 0x584   :  { %1868 = vmatpush3.bf16.msra.mxu0 %v2268_v2  ;;  %1871 = vmatprep.mubr.msk.bf16.mxu0 %vm2201_vm0, %v2200_v0 }
 0x585   :  { %1869 = vmatprep.subr.bf16.mxu0 %v2200_v0 }
 0x588   :  { %1870 = vmatpush3.bf16.msra.mxu0 %v2277_v4 }
 0x589   :  { %1883 = vmatprep.subr.bf16.mxu0 %v2200_v0 }
 0x643   :  { %v398_v62 = vpop.f32.mrf.mxu0 }
 0x644   :  { %v404_v63 = vadd.f32 %v398_v62, %v156_v61 }
 0x645   :  { %v1857_v1 = vpop.f32.mrf.mxu0 }
 0x646   :  { %2019 = vtanh.f32 %v404_v63  ;;  %v1694_v8 = vmul.f32 -1.442695, %v404_v63 }
 0x647   :  { %v401_v3 = vpop.f32.mrf.mxu0 }
 0x648   :  { %2021 = vpow2.f32 %v1694_v8 }
 0x649   :  { %v1858_v5 = vpop.f32.mrf.mxu0 }
 0x653   :  { %v2020_v6 = vpop.eup %2019 }
 0x654   :  { %414 = vrot.lane.b32.xlu0 %v2020_v6, %s2198_s30 }
 0x655   :  { %v2022_v11 = vpop.eup %2021 }
 0x656   :  { %v408_v12 = vadd.f32 1.0, %v2022_v11 }
 0x658   :  { %2023 = vrcp.f32 %v408_v12  ;;  %v167_v12 = vadd.f32 %v2307_v10, %v2357_v60 }
 0x665   :  { %v2024_v13 = vpop.eup %2023 }
 0x666   :  { %v412_v9 = vmul.f32 %v2024_v13, %v341_v49 }
 0x6c6   :  { %v415_v14 = vpop.permute.xlu0 %414 }
 0x6c7   :  { %v417_v15 = vmul.f32 %v2024_v13, %v415_v14 }
 0x6c9   :  { %419 = vrot.lane.b32.xlu1 %v417_v15, %s2203_s3 }
 0x73b   :  { %v420_v16 = vpop.permute.xlu1 %419 }
 0x73c   :  { %v422_v17 = vadd.f32 %v420_v16, %v412_v9 }
 0x73e   :  { %2025 = vtanh.f32 %v422_v17 }
 0x74b   :  { %v2026_v18 = vpop.eup %2025 }
 0x74c   :  { %425 = vrot.lane.b32.xlu0 %v2026_v18, %s2198_s30 }
 0x7be   :  { %v426_v19 = vpop.permute.xlu0 %425 }
 0x7bf   :  { %v428_v20 = vmul.f32 %v2024_v13, %v426_v19 }
 0x7c1   :  { %v2364_v21 = vpack.c.bf16 %v428_v20, %v428_v20 }
 0x7c3   :  { %440 = vrot.lane.b32.xlu1 %v2364_v21, %s2203_s3 }
 0x835   :  { %v441_v22 = vpop.permute.xlu1 %440 }
 0x836   :  { %1864 = vmatmul.mubr.msk.bf16.vlgmr.msra.gmra.mxu1 %vm100_vm1, %v441_v22 }
 0x837   :  { %1876 = vmatpush3.bf16.msra.mxu1 %v2268_v2  ;;  %1879 = vmatprep.mubr.msk.bf16.mxu1 %vm2201_vm0, %v2200_v0 }
 0x838   :  { %1877 = vmatprep.subr.bf16.mxu1 %v2200_v0 }
 0x83b   :  { %1878 = vmatpush3.bf16.msra.mxu1 %v2277_v4 }
 0x83c   :  { %1891 = vmatprep.subr.bf16.mxu1 %v2200_v0 }
 0x8f6   :  { %v479_v24 = vpop.f32.mrf.mxu1 }
 0x8f7   :  { %v485_v25 = vadd.f32 %v479_v24, %v159_v23 }
 0x8f8   :  { %v1865_v26 = vpop.f32.mrf.mxu1 }
 0x8f9   :  { %2027 = vtanh.f32 %v485_v25  ;;  %v1697_v31 = vmul.f32 -1.442695, %v485_v25 }
 0x8fa   :  { %v482_v27 = vpop.f32.mrf.mxu1 }
 0x8fb   :  { %2029 = vpow2.f32 %v1697_v31  ;;  %v172_v31 = vadd.f32 %v2351_v57, %v2307_v10 }
 0x8fc   :  { %v1866_v28 = vpop.f32.mrf.mxu1 }
 0x906   :  { %v2028_v29 = vpop.eup %2027 }
 0x907   :  { %495 = vrot.lane.b32.xlu0 %v2028_v29, %s2198_s30 }
 0x908   :  { %v2030_v33 = vpop.eup %2029 }
 0x909   :  { %v489_v34 = vadd.f32 1.0, %v2030_v33 }
 0x90b   :  { %2031 = vrcp.f32 %v489_v34 }
 0x918   :  { %v2032_v35 = vpop.eup %2031 }
 0x919   :  { %v493_v32 = vmul.f32 %v2032_v35, %v422_v17 }
 0x979   :  { %v496_v36 = vpop.permute.xlu0 %495 }
 0x97a   :  { %v498_v37 = vmul.f32 %v2032_v35, %v496_v36 }
 0x97c   :  { %500 = vrot.lane.b32.xlu1 %v498_v37, %s2203_s3 }
 0x9ee   :  { %v501_v38 = vpop.permute.xlu1 %500 }
 0x9ef   :  { %v503_v39 = vadd.f32 %v501_v38, %v493_v32 }
 0x9f1   :  { %2033 = vtanh.f32 %v503_v39 }
 0x9fe   :  { %v2034_v40 = vpop.eup %2033 }
 0x9ff   :  { %506 = vrot.lane.b32.xlu0 %v2034_v40, %s2198_s30 }
 0xa71   :  { %v507_v41 = vpop.permute.xlu0 %506 }
 0xa72   :  { %v509_v42 = vmul.f32 %v2032_v35, %v507_v41 }
 0xa74   :  { %v2380_v43 = vpack.c.bf16 %v509_v42, %v509_v42 }
 0xa76   :  { %521 = vrot.lane.b32.xlu1 %v2380_v43, %s2203_s3 }
 0xae8   :  { %v522_v44 = vpop.permute.xlu1 %521 }
 0xae9   :  { %1872 = vmatmul.mubr.msk.bf16.vlgmr.msra.gmra.mxu0 %vm100_vm1, %v522_v44 }
 0xaea   :  { %1884 = vmatpush3.bf16.msra.mxu0 %v2268_v2  ;;  %1887 = vmatprep.mubr.msk.bf16.mxu0 %vm2201_vm0, %v2200_v0 }
 0xaeb   :  { %1885 = vmatprep.subr.bf16.mxu0 %v2200_v0 }
 0xaee   :  { %1886 = vmatpush3.bf16.msra.mxu0 %v2277_v4 }
 0xba9   :  { %v560_v46 = vpop.f32.mrf.mxu0 }
 0xbaa   :  { %v566_v47 = vadd.f32 %v560_v46, %v164_v45 }
 0xbab   :  { %v1873_v48 = vpop.f32.mrf.mxu0 }
 0xbac   :  { %2035 = vtanh.f32 %v566_v47  ;;  %v1700_v52 = vmul.f32 -1.442695, %v566_v47 }
 0xbad   :  { %v563_v49 = vpop.f32.mrf.mxu0 }
 0xbae   :  { %2037 = vpow2.f32 %v1700_v52 }
 0xbaf   :  { %v1874_v50 = vpop.f32.mrf.mxu0 }
 0xbb9   :  { %v2036_v51 = vpop.eup %2035 }
 0xbba   :  { %576 = vrot.lane.b32.xlu0 %v2036_v51, %s2198_s30 }
 0xbbb   :  { %v2038_v53 = vpop.eup %2037 }
 0xbbc   :  { %v570_v54 = vadd.f32 1.0, %v2038_v53 }
 0xbbe   :  { %2039 = vrcp.f32 %v570_v54 }
 0xbcb   :  { %v2040_v56 = vpop.eup %2039 }
 0xbcc   :  { %v574_v58 = vmul.f32 %v2040_v56, %v503_v39 }
 0xc2c   :  { %v577_v61 = vpop.permute.xlu0 %576 }
 0xc2d   :  { %v579_v62 = vmul.f32 %v2040_v56, %v577_v61  ;;  %v2448_v61 = vld [vmem:[#allocation4 + $0x8] sm:$0xff]  }
 0xc2f   :  { %581 = vrot.lane.b32.xlu1 %v579_v62, %s2203_s3 }
 0xca1   :  { %v582_v63 = vpop.permute.xlu1 %581 }
 0xca2   :  { %v584_v1 = vadd.f32 %v582_v63, %v574_v58  ;;  %v175_v58 = vadd.f32 %v2355_v59, %v2307_v10 }
 0xca4   :  { %2041 = vtanh.f32 %v584_v1 }
 0xcb1   :  { %v2042_v3 = vpop.eup %2041 }
 0xcb2   :  { %587 = vrot.lane.b32.xlu0 %v2042_v3, %s2198_s30 }
 0xd24   :  { %v588_v5 = vpop.permute.xlu0 %587 }
 0xd25   :  { %v590_v6 = vmul.f32 %v2040_v56, %v588_v5 }
 0xd27   :  { %v2395_v8 = vpack.c.bf16 %v590_v6, %v590_v6 }
 0xd29   :  { %602 = vrot.lane.b32.xlu1 %v2395_v8, %s2203_s3 }
 0xd9b   :  { %v603_v11 = vpop.permute.xlu1 %602 }
 0xd9c   :  { %1880 = vmatmul.mubr.msk.bf16.vlgmr.msra.gmra.mxu1 %vm100_vm1, %v603_v11  ;;  %v2478_v11 = vld [vmem:[%s2656_s6] ss:$0 sm:$0xff]  ;;  %s2204_s6 = smov 96  }
 0xd9d   :  { %1892 = vmatpush3.bf16.msra.mxu1 %v2268_v2  ;;  %1895 = vmatprep.mubr.msk.bf16.mxu1 %vm2201_vm0, %v2200_v0 }
 0xd9e   :  { %1893 = vmatprep.subr.bf16.mxu1 %v2200_v0 }
 0xda1   :  { %1894 = vmatpush3.bf16.msra.mxu1 %v2277_v4 }
 0xda2   :  { %1911 = vmatprep.subr.bf16.mxu1 %v2200_v0 }
 0xe5c   :  { %v641_v13 = vpop.f32.mrf.mxu1 }
 0xe5d   :  { %v647_v14 = vadd.f32 %v641_v13, %v167_v12 }
 0xe5e   :  { %v1881_v15 = vpop.f32.mrf.mxu1 }
 0xe5f   :  { %2043 = vtanh.f32 %v647_v14  ;;  %v1703_v2 = vmul.f32 -1.442695, %v647_v14 }
 0xe60   :  { %v644_v9 = vpop.f32.mrf.mxu1 }
 0xe61   :  { %2045 = vpow2.f32 %v1703_v2 }
 0xe62   :  { %v1882_v16 = vpop.f32.mrf.mxu1 }
 0xe6c   :  { %v2044_v17 = vpop.eup %2043 }
 0xe6d   :  { %657 = vrot.lane.b32.xlu0 %v2044_v17, %s2198_s30 }
 0xe6e   :  { %v2046_v18 = vpop.eup %2045 }
 0xe6f   :  { %v651_v19 = vadd.f32 1.0, %v2046_v18 }
 0xe71   :  { %2047 = vrcp.f32 %v651_v19 }
 0xe7e   :  { %v2048_v4 = vpop.eup %2047 }
 0xe7f   :  { %v655_v60 = vmul.f32 %v2048_v4, %v584_v1 }
 0xedf   :  { %v658_v20 = vpop.permute.xlu0 %657 }
 0xee0   :  { %v660_v22 = vmul.f32 %v2048_v4, %v658_v20 }
 0xee2   :  { %662 = vrot.lane.b32.xlu1 %v660_v22, %s2203_s3 }
 0xf54   :  { %v663_v23 = vpop.permute.xlu1 %662 }
 0xf55   :  { %v665_v24 = vadd.f32 %v663_v23, %v655_v60 }
 0xf57   :  { %2049 = vtanh.f32 %v665_v24 }
 0xf64   :  { %v2050_v25 = vpop.eup %2049 }
 0xf65   :  { %668 = vrot.lane.b32.xlu0 %v2050_v25, %s2198_s30 }
 0xfd7   :  { %v669_v26 = vpop.permute.xlu0 %668 }
 0xfd8   :  { %v671_v27 = vmul.f32 %v2048_v4, %v669_v26 }
 0xfda   :  { %v2411_v28 = vpack.c.bf16 %v671_v27, %v671_v27 }
 0xfdc   :  { %683 = vrot.lane.b32.xlu1 %v2411_v28, %s2203_s3 }
0x104e   :  { %v684_v29 = vpop.permute.xlu1 %683 }
0x104f   :  { %1888 = vmatmul.mubr.msk.bf16.vlgmr.msra.gmra.mxu0 %vm100_vm1, %v684_v29 }
0x110f   :  { %v722_v33 = vpop.f32.mrf.mxu0 }
0x1110   :  { %v728_v34 = vadd.f32 %v722_v33, %v172_v31 }
0x1111   :  { %v1889_v35 = vpop.f32.mrf.mxu0 }
0x1112   :  { %2051 = vtanh.f32 %v728_v34  ;;  %v1706_v38 = vmul.f32 -1.442695, %v728_v34 }
0x1113   :  { %v725_v36 = vpop.f32.mrf.mxu0 }
0x1114   :  { %2053 = vpow2.f32 %v1706_v38 }
0x1115   :  { %v1890_v37 = vpop.f32.mrf.mxu0 }
0x111f   :  { %v2052_v32 = vpop.eup %2051 }
0x1120   :  { %738 = vrot.lane.b32.xlu0 %v2052_v32, %s2198_s30 }
0x1121   :  { %v2054_v39 = vpop.eup %2053 }
0x1122   :  { %v732_v40 = vadd.f32 1.0, %v2054_v39 }
0x1124   :  { %2055 = vrcp.f32 %v732_v40 }
0x1131   :  { %v2056_v41 = vpop.eup %2055 }
0x1132   :  { %v736_v57 = vmul.f32 %v2056_v41, %v665_v24 }
0x1192   :  { %v739_v42 = vpop.permute.xlu0 %738 }
0x1193   :  { %v741_v44 = vmul.f32 %v2056_v41, %v739_v42 }
0x1195   :  { %743 = vrot.lane.b32.xlu1 %v741_v44, %s2203_s3 }
0x1199   :  { %271 = vrot.lane.b32.xlu1 %v2313_v30, %s2203_s3  ;;  %v1995_v30 = vld [vmem:[%s2654_s4 + $0x8] sm:$0xff]  }
0x119a   :  { %1899 = vmatprep.subr.bf16.mxu0 %v1995_v30 }
0x119b   :  { %1900 = vmatpush3.bf16.msra.mxu0 %v1995_v30 }
0x119d   :  { %433 = vrot.lane.b32.xlu1 %v2364_v21, %s2203_s3  ;;  %v1996_v21 = vld [vmem:[%s2654_s4] sm:$0xff]  }
0x119e   :  { %1901 = vmatprep.subr.bf16.mxu0 %v1996_v21 }
0x119f   :  { %1902 = vmatpush3.bf16.msra.mxu0 %v1996_v21 }
0x11a0   :  { %1927 = vmatprep.subr.bf16.mxu0 %v2200_v0 }
0x1207   :  { %v744_v45 = vpop.permute.xlu1 %743 }
0x1208   :  { %v2424_v46 = vadd.f32 %v744_v45, %v736_v57 }
0x120a   :  { %2057 = vtanh.f32 %v2424_v46 }
0x120b   :  { %v272_v47 = vpop.permute.xlu1 %271 }
0x120c   :  { %275 = vst.msk [vmem:[#allocation2] sm:$0xf] %vm274_vm2, %v272_v47 }
0x120f   :  { %v434_v48 = vpop.permute.xlu1 %433 }
0x1210   :  { %437 = vst.msk [vmem:[#allocation2 + $0x8] sm:$0xf] %vm274_vm2, %v434_v48 }
0x1217   :  { %v2058_v49 = vpop.eup %2057 }
0x1218   :  { %749 = vrot.lane.b32.xlu0 %v2058_v49, %s2198_s30 }
0x121c   :  { %352 = vrot.lane.b32.xlu0 %v2340_v55, %s2203_s3 }
0x1220   :  { %514 = vrot.lane.b32.xlu0 %v2380_v43, %s2203_s3  ;;  %v2453_v43 = vld [vmem:[#allocation4] sm:$0xff]  }
0x128a   :  { %v750_v50 = vpop.permute.xlu0 %749 }
0x128b   :  { %v752_v51 = vmul.f32 %v2056_v41, %v750_v50 }
0x128d   :  { %v2441_v52 = vpack.c.bf16 %v752_v51, %v752_v51 }
0x128e   :  { %v353_v53 = vpop.permute.xlu0 %352 }
0x128f   :  { %356 = vst.msk [vmem:[#allocation2 + $0x4] sm:$0xf] %vm274_vm2, %v353_v53  ;;  %764 = vrot.lane.b32.xlu1 %v2441_v52, %s2203_s3 }
0x1292   :  { %v515_v54 = vpop.permute.xlu0 %514 }
0x1293   :  { %518 = vst.msk [vmem:[#allocation2 + $0xc] sm:$0xf] %vm274_vm2, %v515_v54 }
0x1296   :  { %v1997_v56 = vld [vmem:[#allocation2] sm:$0xff]  }
0x1297   :  { %1903 = vmatprep.mubr.msk.bf16.mxu0 %vm100_vm1, %v1997_v56 }
0x129a   :  { %v1998_v55 = vld [vmem:[#allocation2 + $0x8] sm:$0xff]  }
0x129b   :  { %1904 = vmatmul.mubr.msk.bf16.vlgmr.msra.gmra.mxu0 %vm100_vm1, %v1998_v55 }
0x129c   :  { %1928 = vmatpush3.bf16.msra.mxu0 %v2448_v61 }
0x129d   :  { %1929 = vmatprep.subr.bf16.mxu0 %v2200_v0 }
0x12a0   :  { %1930 = vmatpush3.bf16.msra.mxu0 %v2453_v43 }
0x12a1   :  { %1943 = vmatprep.subr.bf16.mxu0 %v2200_v0 }
0x1301   :  { %v765_v62 = vpop.permute.xlu1 %764 }
0x1302   :  { %1896 = vmatmul.mubr.msk.bf16.vlgmr.msra.gmra.mxu1 %vm100_vm1, %v765_v62 }
0x1303   :  { %1912 = vmatpush3.bf16.msra.mxu1 %v2448_v61  ;;  %1915 = vmatprep.mubr.msk.bf16.mxu1 %vm2201_vm0, %v2200_v0 }
0x1304   :  { %1913 = vmatprep.subr.bf16.mxu1 %v2200_v0 }
0x1307   :  { %1914 = vmatpush3.bf16.msra.mxu1 %v2453_v43 }
0x1308   :  { %1919 = vmatprep.subr.bf16.mxu1 %v2200_v0 }
0x130a   :  { %1916 = vmatmul.mubr.bf16.vlgmr.msra.gmra.mxu1 %v2202_v7 }
0x130b   :  { %1920 = vmatpush3.bf16.msra.mxu1 %v2448_v61  ;;  %1923 = vmatprep.mubr.msk.bf16.mxu1 %vm2201_vm0, %v2200_v0 }
0x130c   :  { %1921 = vmatprep.subr.bf16.mxu1 %v2200_v0 }
0x130f   :  { %1922 = vmatpush3.bf16.msra.mxu1 %v2453_v43 }
0x1310   :  { %1935 = vmatprep.subr.bf16.mxu1 %v2200_v0 }
0x135b   :  { %v2473_v63 = vpop.f32.mrf.mxu0 }
0x135d   :  { %v954_v7 = vpop.f32.mrf.mxu0 }
0x135e   :  { %v955_v13 = vadd.f32 %v2478_v11, %v954_v7 }
0x135f   :  { %v2508_v45 = vpop.f32.mrf.mxu0 }
0x13c2   :  { %v803_v1 = vpop.f32.mrf.mxu1 }
0x13c3   :  { %v809_v3 = vadd.f32 %v803_v1, %v175_v58 }
0x13c4   :  { %v1897_v5 = vpop.f32.mrf.mxu1 }
0x13c5   :  { %v1709_v26 = vmul.f32 -1.442695, %v809_v3 }
0x13c6   :  { %v806_v6 = vpop.f32.mrf.mxu1 }
0x13c8   :  { %v1898_v12 = vpop.f32.mrf.mxu1 }
0x13ca   :  { %v1040_v14 = vpop.f32.mrf.mxu1 }
0x13cb   :  { %v1046_v15 = vadd.f32 %v1040_v14, %v955_v13 }
0x13cc   :  { %v1917_v9 = vpop.f32.mrf.mxu1 }
0x13cd   :  { %2059 = vtanh.f32 %v1046_v15  ;;  %v1724_v17 = vmul.f32 -1.442695, %v1046_v15 }
0x13ce   :  { %v1043_v10 = vpop.f32.mrf.mxu1 }
0x13cf   :  { %2061 = vpow2.f32 %v1724_v17 }
0x13d0   :  { %v1918_v59 = vpop.f32.mrf.mxu1 }
0x13da   :  { %v2060_v16 = vpop.eup %2059 }
0x13db   :  { %1056 = vrot.lane.b32.xlu0 %v2060_v16, %s2198_s30 }
0x13dc   :  { %v2062_v2 = vpop.eup %2061 }
0x13dd   :  { %v1050_v18 = vadd.f32 1.0, %v2062_v2 }
0x13df   :  { %2063 = vrcp.f32 %v1050_v18  ;;  %v963_v18 = vadd.f32 %v2473_v63, %v2478_v11 }
0x13ec   :  { %v2064_v19 = vpop.eup %2063 }
0x13ed   :  { %v1054_v22 = vmul.f32 0.0, %v2064_v19 }
0x144d   :  { %v1057_v4 = vpop.permute.xlu0 %1056 }
0x144e   :  { %v1059_v20 = vmul.f32 %v2064_v19, %v1057_v4 }
0x1450   :  { %1061 = vrot.lane.b32.xlu1 %v1059_v20, %s2203_s3 }
0x14c2   :  { %v1062_v60 = vpop.permute.xlu1 %1061 }
0x14c3   :  { %v1064_v23 = vadd.f32 %v1062_v60, %v1054_v22 }
0x14c5   :  { %2065 = vtanh.f32 %v1064_v23 }
0x14c6   :  { %2067 = vtanh.f32 %v809_v3 }
0x14c7   :  { %2069 = vpow2.f32 %v1709_v26 }
0x14d2   :  { %v2066_v24 = vpop.eup %2065 }
0x14d3   :  { %1067 = vrot.lane.b32.xlu0 %v2066_v24, %s2198_s30  ;;  %v2068_v25 = vpop.eup %2067 }
0x14d4   :  { %v2070_v27 = vpop.eup %2069 }
0x14d5   :  { %v813_v29 = vadd.f32 1.0, %v2070_v27 }
0x14d7   :  { %819 = vrot.lane.b32.xlu0 %v2068_v25, %s2198_s30  ;;  %2071 = vrcp.f32 %v813_v29 }
0x14e4   :  { %v2072_v35 = vpop.eup %2071 }
0x14e5   :  { %v817_v38 = vmul.f32 %v2072_v35, %v2424_v46  ;;  %v957_v46 = vpop.f32.mrf.mxu0 }
0x14e6   :  { %v958_v47 = vadd.f32 %v2478_v11, %v957_v46 }
0x1545   :  { %v1068_v31 = vpop.permute.xlu0 %1067 }
0x1546   :  { %v1070_v33 = vmul.f32 %v2064_v19, %v1068_v31 }
0x1548   :  { %v2485_v34 = vpack.c.bf16 %v1070_v33, %v1070_v33 }
0x1549   :  { %v820_v36 = vpop.permute.xlu0 %819 }
0x154a   :  { %v822_v37 = vmul.f32 %v2072_v35, %v820_v36  ;;  %1080 = vrot.lane.b32.xlu1 %v2485_v34, %s2203_s3 }
0x154c   :  { %824 = vrot.lane.b32.xlu0 %v822_v37, %s2203_s3 }
0x15bc   :  { %v1081_v32 = vpop.permute.xlu1 %1080 }
0x15bd   :  { %1924 = vmatmul.mubr.msk.bf16.vlgmr.msra.gmra.mxu1 %vm100_vm1, %v1081_v32 }
0x15be   :  { %v825_v39 = vpop.permute.xlu0 %824  ;;  %1936 = vmatpush3.bf16.msra.mxu1 %v2448_v61  ;;  %1939 = vmatprep.mubr.msk.bf16.mxu1 %vm2201_vm0, %v2200_v0 }
0x15bf   :  { %v2495_v40 = vadd.f32 %v825_v39, %v817_v38  ;;  %1937 = vmatprep.subr.bf16.mxu1 %v2200_v0 }
0x15c1   :  { %2073 = vtanh.f32 %v2495_v40 }
0x15c2   :  { %1938 = vmatpush3.bf16.msra.mxu1 %v2453_v43 }
0x15c3   :  { %1951 = vmatprep.subr.bf16.mxu1 %v2200_v0 }
0x15ce   :  { %v2074_v41 = vpop.eup %2073 }
0x15cf   :  { %830 = vrot.lane.b32.xlu0 %v2074_v41, %s2198_s30  ;;  %v966_v41 = vadd.f32 %v2508_v45, %v2478_v11 }
0x15d3   :  { %595 = vrot.lane.b32.xlu0 %v2395_v8, %s2203_s3 }
0x15d7   :  { %757 = vrot.lane.b32.xlu0 %v2441_v52, %s2203_s3 }
0x1641   :  { %v831_v42 = vpop.permute.xlu0 %830 }
0x1642   :  { %v2514_v5 = vmul.f32 %v2072_v35, %v831_v42 }
0x1644   :  { %v1754_v7 = vpack.c.bf16 %v2514_v5, %v2514_v5 }
0x1645   :  { %v596_v44 = vpop.permute.xlu0 %595 }
0x1646   :  { %599 = vst.msk [vmem:[#allocation2 + $0x10] sm:$0xf] %vm274_vm2, %v596_v44 }
0x1649   :  { %v758_v57 = vpop.permute.xlu0 %757 }
0x164a   :  { %761 = vst.msk [vmem:[#allocation2 + $0x18] sm:$0xf] %vm274_vm2, %v758_v57 }
0x167d   :  { %v1119_v48 = vpop.f32.mrf.mxu1 }
0x167e   :  { %v1125_v30 = vadd.f32 %v1119_v48, %v958_v47 }
0x167f   :  { %v1925_v21 = vpop.f32.mrf.mxu1 }
0x1680   :  { %2075 = vtanh.f32 %v1125_v30  ;;  %v1727_v51 = vmul.f32 -1.442695, %v1125_v30 }
0x1681   :  { %v1122_v8 = vpop.f32.mrf.mxu1 }
0x1682   :  { %2077 = vpow2.f32 %v1727_v51 }
0x1683   :  { %v1926_v49 = vpop.f32.mrf.mxu1 }
0x168d   :  { %v2076_v50 = vpop.eup %2075 }
0x168e   :  { %1135 = vrot.lane.b32.xlu1 %v2076_v50, %s2198_s30 }
0x168f   :  { %v2078_v52 = vpop.eup %2077 }
0x1690   :  { %v1129_v53 = vadd.f32 1.0, %v2078_v52 }
0x1692   :  { %2079 = vrcp.f32 %v1129_v53 }
0x169f   :  { %v2080_v54 = vpop.eup %2079 }
0x16a0   :  { %v1133_v62 = vmul.f32 %v2080_v54, %v1064_v23 }
0x1700   :  { %v1136_v56 = vpop.permute.xlu1 %1135 }
0x1701   :  { %v1138_v55 = vmul.f32 %v2080_v54, %v1136_v56 }
0x1703   :  { %1140 = vrot.lane.b32.xlu1 %v1138_v55, %s2203_s3 }
0x1775   :  { %v1141_v58 = vpop.permute.xlu1 %1140 }
0x1776   :  { %v1143_v1 = vadd.f32 %v1141_v58, %v1133_v62 }
0x1778   :  { %2081 = vtanh.f32 %v1143_v1 }
0x1785   :  { %v2082_v3 = vpop.eup %2081 }
0x1786   :  { %1146 = vrot.lane.b32.xlu1 %v2082_v3, %s2198_s30 }
0x178a   :  { %676 = vrot.lane.b32.xlu1 %v2411_v28, %s2203_s3 }
0x178e   :  { %838 = vrot.lane.b32.xlu1 %v1754_v7, %s2203_s3 }
0x17f8   :  { %v1147_v6 = vpop.permute.xlu1 %1146 }
0x17f9   :  { %v1149_v12 = vmul.f32 %v2080_v54, %v1147_v6 }
0x17fb   :  { %v2521_v13 = vpack.c.bf16 %v1149_v12, %v1149_v12 }
0x17fc   :  { %v677_v14 = vpop.permute.xlu1 %676 }
0x17fd   :  { %680 = vst.msk [vmem:[#allocation2 + $0x14] sm:$0xf] %vm274_vm2, %v677_v14  ;;  %1159 = vrot.lane.b32.xlu0 %v2521_v13, %s2203_s3 }
0x1800   :  { %v839_v15 = vpop.permute.xlu1 %838 }
0x1801   :  { %842 = vst.msk [vmem:[#allocation2 + $0x1c] sm:$0xf] %vm274_vm2, %v839_v15 }
0x1804   :  { %v2001_v9 = vld [vmem:[#allocation2 + $0x10] sm:$0xff]  }
0x1805   :  { %1907 = vmatprep.mubr.msk.bf16.mxu0 %vm100_vm1, %v2001_v9 }
0x1808   :  { %v2002_v28 = vld [vmem:[#allocation2 + $0x18] sm:$0xff]  }
0x1809   :  { %1908 = vmatmul.mubr.msk.bf16.gmra.mxu0 %vm100_vm1, %v2002_v28 }
0x180a   :  { %1931 = vmatprep.mubr.msk.bf16.mxu0 %vm2201_vm0, %v2200_v0 }
0x186f   :  { %v1160_v10 = vpop.permute.xlu0 %1159 }
0x1870   :  { %1932 = vmatmul.mubr.msk.bf16.vlgmr.msra.gmra.mxu0 %vm100_vm1, %v1160_v10 }
0x1871   :  { %1944 = vmatpush3.bf16.msra.mxu0 %v2448_v61  ;;  %1947 = vmatprep.mubr.msk.bf16.mxu0 %vm2201_vm0, %v2200_v0 }
0x1872   :  { %1945 = vmatprep.subr.bf16.mxu0 %v2200_v0 }
0x1875   :  { %1946 = vmatpush3.bf16.msra.mxu0 %v2453_v43 }
0x1876   :  { %1959 = vmatprep.subr.bf16.mxu0 %v2200_v0 }
0x18c9   :  { %v2538_v59 = vpop.f32.mrf.mxu0 }
0x18cb   :  { %v2540_v16 = vpop.f32.mrf.mxu0 }
0x18cd   :  { %v2542_v17 = vpop.f32.mrf.mxu0 }
0x18cf   :  { %v2544_v2 = vpop.f32.mrf.mxu0 }
0x1930   :  { %v1198_v19 = vpop.f32.mrf.mxu0 }
0x1931   :  { %v1204_v4 = vadd.f32 %v1198_v19, %v963_v18 }
0x1932   :  { %v1933_v20 = vpop.f32.mrf.mxu0 }
0x1933   :  { %2083 = vtanh.f32 %v1204_v4  ;;  %v1730_v24 = vmul.f32 -1.442695, %v1204_v4 }
0x1934   :  { %v1201_v22 = vpop.f32.mrf.mxu0 }
0x1935   :  { %2085 = vpow2.f32 %v1730_v24 }
0x1936   :  { %v1934_v60 = vpop.f32.mrf.mxu0 }
0x1940   :  { %v2084_v23 = vpop.eup %2083 }
0x1941   :  { %1214 = vrot.lane.b32.xlu1 %v2084_v23, %s2198_s30 }
0x1942   :  { %v2086_v25 = vpop.eup %2085 }
0x1943   :  { %v1208_v26 = vadd.f32 1.0, %v2086_v25 }
0x1945   :  { %2087 = vrcp.f32 %v1208_v26 }
0x1952   :  { %v2088_v27 = vpop.eup %2087 }
0x1953   :  { %v1212_v63 = vmul.f32 %v2088_v27, %v1143_v1  ;;  %v971_v1 = vadd.f32 %v2478_v11, %v2540_v16 }
0x19b3   :  { %v1215_v29 = vpop.permute.xlu1 %1214 }
0x19b4   :  { %v1217_v31 = vmul.f32 %v2088_v27, %v1215_v29 }
0x19b6   :  { %1219 = vrot.lane.b32.xlu0 %v1217_v31, %s2203_s3 }
0x1a28   :  { %v1220_v33 = vpop.permute.xlu0 %1219 }
0x1a29   :  { %v1222_v35 = vadd.f32 %v1220_v33, %v1212_v63 }
0x1a2b   :  { %2089 = vtanh.f32 %v1222_v35 }
0x1a38   :  { %v2090_v36 = vpop.eup %2089 }
0x1a39   :  { %1225 = vrot.lane.b32.xlu1 %v2090_v36, %s2198_s30 }
0x1aab   :  { %v1226_v37 = vpop.permute.xlu1 %1225 }
0x1aac   :  { %v1228_v32 = vmul.f32 %v2088_v27, %v1226_v37  ;;  %v974_v27 = vadd.f32 %v2478_v11, %v2544_v2 }
0x1aae   :  { %v2551_v38 = vpack.c.bf16 %v1228_v32, %v1228_v32 }
0x1ab0   :  { %1238 = vrot.lane.b32.xlu0 %v2551_v38, %s2203_s3 }
0x1b22   :  { %v1239_v39 = vpop.permute.xlu0 %1238 }
0x1b23   :  { %1940 = vmatmul.mubr.msk.bf16.vlgmr.msra.gmra.mxu1 %vm100_vm1, %v1239_v39 }
0x1b24   :  { %1952 = vmatpush3.bf16.msra.mxu1 %v2448_v61  ;;  %1955 = vmatprep.mubr.msk.bf16.mxu1 %vm2201_vm0, %v2200_v0 }
0x1b25   :  { %1953 = vmatprep.subr.bf16.mxu1 %v2200_v0 }
0x1b28   :  { %1954 = vmatpush3.bf16.msra.mxu1 %v2453_v43 }
0x1b29   :  { %1967 = vmatprep.subr.bf16.mxu1 %v2200_v0 }
0x1be3   :  { %v1277_v42 = vpop.f32.mrf.mxu1 }
0x1be4   :  { %v1283_v44 = vadd.f32 %v1277_v42, %v966_v41 }
0x1be5   :  { %v1941_v57 = vpop.f32.mrf.mxu1 }
0x1be6   :  { %2091 = vtanh.f32 %v1283_v44  ;;  %v1733_v30 = vmul.f32 -1.442695, %v1283_v44 }
0x1be7   :  { %v1280_v46 = vpop.f32.mrf.mxu1 }
0x1be8   :  { %2093 = vpow2.f32 %v1733_v30  ;;  %v979_v30 = vadd.f32 %v2538_v59, %v2478_v11 }
0x1be9   :  { %v1942_v47 = vpop.f32.mrf.mxu1 }
0x1bf3   :  { %v2092_v48 = vpop.eup %2091 }
0x1bf4   :  { %1293 = vrot.lane.b32.xlu1 %v2092_v48, %s2198_s30 }
0x1bf5   :  { %v2094_v21 = vpop.eup %2093 }
0x1bf6   :  { %v1287_v8 = vadd.f32 1.0, %v2094_v21 }
0x1bf8   :  { %2095 = vrcp.f32 %v1287_v8 }
0x1c05   :  { %v2096_v49 = vpop.eup %2095 }
0x1c06   :  { %v1291_v45 = vmul.f32 %v2096_v49, %v1222_v35 }
0x1c66   :  { %v1294_v50 = vpop.permute.xlu1 %1293 }
0x1c67   :  { %v1296_v51 = vmul.f32 %v2096_v49, %v1294_v50 }
0x1c69   :  { %1298 = vrot.lane.b32.xlu0 %v1296_v51, %s2203_s3 }
0x1cdb   :  { %v1299_v52 = vpop.permute.xlu0 %1298 }
0x1cdc   :  { %v1301_v53 = vadd.f32 %v1299_v52, %v1291_v45 }
0x1cde   :  { %2097 = vtanh.f32 %v1301_v53 }
0x1ceb   :  { %v2098_v54 = vpop.eup %2097 }
0x1cec   :  { %1304 = vrot.lane.b32.xlu1 %v2098_v54, %s2198_s30 }
0x1d5e   :  { %v1305_v56 = vpop.permute.xlu1 %1304 }
0x1d5f   :  { %v1307_v55 = vmul.f32 %v2096_v49, %v1305_v56 }
0x1d61   :  { %v2567_v62 = vpack.c.bf16 %v1307_v55, %v1307_v55 }
0x1d63   :  { %1317 = vrot.lane.b32.xlu0 %v2567_v62, %s2203_s3 }
0x1dd5   :  { %v1318_v58 = vpop.permute.xlu0 %1317 }
0x1dd6   :  { %1948 = vmatmul.mubr.msk.bf16.vlgmr.msra.gmra.mxu0 %vm100_vm1, %v1318_v58 }
0x1dd7   :  { %1960 = vmatpush3.bf16.msra.mxu0 %v2448_v61  ;;  %1963 = vmatprep.mubr.msk.bf16.mxu0 %vm2201_vm0, %v2200_v0 }
0x1dd8   :  { %1961 = vmatprep.subr.bf16.mxu0 %v2200_v0 }
0x1ddb   :  { %1962 = vmatpush3.bf16.msra.mxu0 %v2453_v43 }
0x1e96   :  { %v1356_v3 = vpop.f32.mrf.mxu0 }
0x1e97   :  { %v1362_v7 = vadd.f32 %v1356_v3, %v971_v1 }
0x1e98   :  { %v1949_v6 = vpop.f32.mrf.mxu0 }
0x1e99   :  { %2099 = vtanh.f32 %v1362_v7  ;;  %v1736_v9 = vmul.f32 -1.442695, %v1362_v7 }
0x1e9a   :  { %v1359_v12 = vpop.f32.mrf.mxu0 }
0x1e9b   :  { %2101 = vpow2.f32 %v1736_v9  ;;  %v982_v9 = vadd.f32 %v2542_v17, %v2478_v11 }
0x1e9c   :  { %v1950_v14 = vpop.f32.mrf.mxu0 }
0x1ea6   :  { %v2100_v15 = vpop.eup %2099 }
0x1ea7   :  { %1372 = vrot.lane.b32.xlu1 %v2100_v15, %s2198_s30 }
0x1ea8   :  { %v2102_v28 = vpop.eup %2101 }
0x1ea9   :  { %v1366_v10 = vadd.f32 1.0, %v2102_v28 }
0x1eab   :  { %2103 = vrcp.f32 %v1366_v10 }
0x1eb8   :  { %v2104_v18 = vpop.eup %2103 }
0x1eb9   :  { %v1370_v16 = vmul.f32 %v2104_v18, %v1301_v53 }
0x1f19   :  { %v1373_v19 = vpop.permute.xlu1 %1372 }
0x1f1a   :  { %v1375_v4 = vmul.f32 %v2104_v18, %v1373_v19 }
0x1f1c   :  { %1377 = vrot.lane.b32.xlu0 %v1375_v4, %s2203_s3 }
0x1f8e   :  { %v1378_v20 = vpop.permute.xlu0 %1377 }
0x1f8f   :  { %v1380_v22 = vadd.f32 %v1378_v20, %v1370_v16 }
0x1f91   :  { %2105 = vtanh.f32 %v1380_v22 }
0x1f9e   :  { %v2106_v60 = vpop.eup %2105 }
0x1f9f   :  { %1383 = vrot.lane.b32.xlu1 %v2106_v60, %s2198_s30 }
0x2011   :  { %v1384_v23 = vpop.permute.xlu1 %1383 }
0x2012   :  { %v1386_v24 = vmul.f32 %v2104_v18, %v1384_v23 }
0x2014   :  { %v2582_v25 = vpack.c.bf16 %v1386_v24, %v1386_v24 }
0x2016   :  { %1396 = vrot.lane.b32.xlu0 %v2582_v25, %s2203_s3 }
0x2088   :  { %v1397_v26 = vpop.permute.xlu0 %1396 }
0x2089   :  { %1956 = vmatmul.mubr.msk.bf16.vlgmr.msra.gmra.mxu1 %vm100_vm1, %v1397_v26 }
0x208a   :  { %1968 = vmatpush3.bf16.msra.mxu1 %v2448_v61  ;;  %1971 = vmatprep.mubr.msk.bf16.mxu1 %vm2201_vm0, %v2200_v0 }
0x208b   :  { %1969 = vmatprep.subr.bf16.mxu1 %v2200_v0 }
0x208e   :  { %1970 = vmatpush3.bf16.msra.mxu1 %v2453_v43 }
0x2149   :  { %v1435_v29 = vpop.f32.mrf.mxu1 }
0x214a   :  { %v1441_v31 = vadd.f32 %v1435_v29, %v974_v27 }
0x214b   :  { %v1957_v63 = vpop.f32.mrf.mxu1 }
0x214c   :  { %2107 = vtanh.f32 %v1441_v31  ;;  %v1739_v61 = vmul.f32 -1.442695, %v1441_v31 }
0x214d   :  { %v1438_v33 = vpop.f32.mrf.mxu1 }
0x214e   :  { %2109 = vpow2.f32 %v1739_v61 }
0x214f   :  { %v1958_v35 = vpop.f32.mrf.mxu1 }
0x2159   :  { %v2108_v36 = vpop.eup %2107 }
0x215a   :  { %1451 = vrot.lane.b32.xlu1 %v2108_v36, %s2198_s30 }
0x215b   :  { %v2110_v37 = vpop.eup %2109 }
0x215c   :  { %v1445_v32 = vadd.f32 1.0, %v2110_v37 }
0x215e   :  { %2111 = vrcp.f32 %v1445_v32 }
0x216b   :  { %v2112_v0 = vpop.eup %2111 }
0x216c   :  { %v1449_v2 = vmul.f32 %v2112_v0, %v1380_v22 }
0x21cc   :  { %v1452_v39 = vpop.permute.xlu1 %1451 }
0x21cd   :  { %v1454_v43 = vmul.f32 %v2112_v0, %v1452_v39 }
0x21cf   :  { %1456 = vrot.lane.b32.xlu0 %v1454_v43, %s2203_s3 }
0x2241   :  { %v1457_v41 = vpop.permute.xlu0 %1456 }
0x2242   :  { %v1459_v42 = vadd.f32 %v1457_v41, %v1449_v2 }
0x2244   :  { %2113 = vtanh.f32 %v1459_v42 }
0x2251   :  { %v2114_v44 = vpop.eup %2113 }
0x2252   :  { %1462 = vrot.lane.b32.xlu1 %v2114_v44, %s2198_s30 }
0x22c4   :  { %v1463_v57 = vpop.permute.xlu1 %1462 }
0x22c5   :  { %v1465_v46 = vmul.f32 %v2112_v0, %v1463_v57 }
0x22c7   :  { %v2597_v47 = vpack.c.bf16 %v1465_v46, %v1465_v46 }
0x22c9   :  { %1475 = vrot.lane.b32.xlu0 %v2597_v47, %s2203_s3 }
0x233b   :  { %v1476_v48 = vpop.permute.xlu0 %1475 }
0x233c   :  { %1964 = vmatmul.mubr.msk.bf16.vlgmr.msra.gmra.mxu0 %vm100_vm1, %v1476_v48 }
0x23fc   :  { %v1514_v21 = vpop.f32.mrf.mxu0 }
0x23fd   :  { %v1520_v8 = vadd.f32 %v1514_v21, %v979_v30 }
0x23fe   :  { %v1965_v49 = vpop.f32.mrf.mxu0 }
0x23ff   :  { %2115 = vtanh.f32 %v1520_v8  ;;  %v1742_v52 = vmul.f32 -1.442695, %v1520_v8 }
0x2400   :  { %v1517_v50 = vpop.f32.mrf.mxu0 }
0x2401   :  { %2117 = vpow2.f32 %v1742_v52 }
0x2402   :  { %v1966_v51 = vpop.f32.mrf.mxu0 }
0x240c   :  { %v2116_v45 = vpop.eup %2115 }
0x240d   :  { %1530 = vrot.lane.b32.xlu1 %v2116_v45, %s2198_s30 }
0x240e   :  { %v2118_v53 = vpop.eup %2117 }
0x240f   :  { %v1524_v54 = vadd.f32 1.0, %v2118_v53 }
0x2411   :  { %2119 = vrcp.f32 %v1524_v54 }
0x241e   :  { %v2120_v56 = vpop.eup %2119 }
0x241f   :  { %v1528_v59 = vmul.f32 %v2120_v56, %v1459_v42 }
0x247f   :  { %v1531_v55 = vpop.permute.xlu1 %1530 }
0x2480   :  { %v1533_v58 = vmul.f32 %v2120_v56, %v1531_v55 }
0x2482   :  { %1535 = vrot.lane.b32.xlu0 %v1533_v58, %s2203_s3 }
0x24f4   :  { %v1536_v1 = vpop.permute.xlu0 %1535 }
0x24f5   :  { %v1538_v3 = vadd.f32 %v1536_v1, %v1528_v59 }
0x24f7   :  { %2121 = vtanh.f32 %v1538_v3 }
0x2504   :  { %v2122_v7 = vpop.eup %2121 }
0x2505   :  { %1541 = vrot.lane.b32.xlu1 %v2122_v7, %s2198_s30 }
0x2577   :  { %v1542_v6 = vpop.permute.xlu1 %1541 }
0x2578   :  { %v1544_v12 = vmul.f32 %v2120_v56, %v1542_v6 }
0x257a   :  { %v1545_v14 = vpack.c.bf16 %v1544_v12, %v1544_v12 }
0x257c   :  { %1554 = vrot.lane.b32.xlu0 %v1545_v14, %s2203_s3 }
0x25ee   :  { %v1555_v15 = vpop.permute.xlu0 %1554 }
0x25ef   :  { %1972 = vmatmul.mubr.msk.bf16.vlgmr.msra.gmra.mxu1 %vm100_vm1, %v1555_v15 }
0x26af   :  { %v1593_v28 = vpop.f32.mrf.mxu1 }
0x26b0   :  { %v1599_v10 = vadd.f32 %v1593_v28, %v982_v9 }
0x26b1   :  { %v1973_v18 = vpop.f32.mrf.mxu1 }
0x26b2   :  { %2123 = vtanh.f32 %v1599_v10  ;;  %v1745_v20 = vmul.f32 -1.442695, %v1599_v10 }
0x26b3   :  { %v1596_v19 = vpop.f32.mrf.mxu1 }
0x26b4   :  { %2125 = vpow2.f32 %v1745_v20 }
0x26b5   :  { %v1974_v4 = vpop.f32.mrf.mxu1 }
0x26bf   :  { %v2124_v16 = vpop.eup %2123 }
0x26c0   :  { %1609 = vrot.lane.b32.xlu1 %v2124_v16, %s2198_s30 }
0x26c1   :  { %v2126_v22 = vpop.eup %2125 }
0x26c2   :  { %v1603_v60 = vadd.f32 1.0, %v2126_v22 }
0x26c4   :  { %2127 = vrcp.f32 %v1603_v60 }
0x26d1   :  { %v2128_v23 = vpop.eup %2127 }
0x26d2   :  { %v1607_v11 = vmul.f32 %v2128_v23, %v1538_v3 }
0x2732   :  { %v1610_v24 = vpop.permute.xlu1 %1609 }
0x2733   :  { %v1612_v26 = vmul.f32 %v2128_v23, %v1610_v24 }
0x2735   :  { %1614 = vrot.lane.b32.xlu0 %v1612_v26, %s2203_s3 }
0x2739   :  { %844 = vrot.lane.b32.xlu0 %v2514_v5, %s2203_s3 }
0x273d   :  { %1075 = vrot.lane.b32.xlu0 %v2485_v34, %s2203_s3 }
0x2741   :  { %1233 = vrot.lane.b32.xlu0 %v2551_v38, %s2203_s3 }
0x2745   :  { %1391 = vrot.lane.b32.xlu0 %v2582_v25, %s2203_s3 }
0x27a7   :  { %v1615_v17 = vpop.permute.xlu0 %1614 }
0x27a8   :  { %v1617_v27 = vadd.f32 %v1615_v17, %v1607_v11 }
0x27aa   :  { %2129 = vtanh.f32 %v1617_v27 }
0x27ab   :  { %v845_v29 = vpop.permute.xlu0 %844 }
0x27ac   :  { %847 = vst.msk [vmem:[#allocation7] sm:$0xff] %vm100_vm1, %v845_v29 }
0x27af   :  { %v1076_v31 = vpop.permute.xlu0 %1075 }
0x27b0   :  { %1078 = vst.msk [vmem:[#allocation2] sm:$0xf] %vm274_vm2, %v1076_v31 }
0x27b3   :  { %v1234_v5 = vpop.permute.xlu0 %1233 }
0x27b4   :  { %1236 = vst.msk [vmem:[#allocation2 + $0x8] sm:$0xf] %vm274_vm2, %v1234_v5 }
0x27b7   :  { %v2130_v34 = vpop.eup %2129  ;;  %v1392_v63 = vpop.permute.xlu0 %1391 }
0x27b8   :  { %1394 = vst.msk [vmem:[#allocation2 + $0x10] sm:$0xf] %vm274_vm2, %v1392_v63  ;;  %1620 = vrot.lane.b32.xlu1 %v2130_v34, %s2198_s30  ;;  %s2205_s30 = smov [#allocation8]  }
0x27b9   :  { %s1659_s10 = sshll.u32 %s2205_s30, 4  ;;  %s1660_s10 = int_to_ptr.vmem [resolvable:$true] %s1659_s10 }
0x27ba   :  { %s2151_s11 = scalar_lea.vmem %s1660_s10, 256  ;;  %p2156_p6 = scmp.lt.s32.totalorder %s1660_s10, %s1660_s10 }
0x27bb   :  { %p2152_p5 = scmp.ne.s32.totalorder %s1660_s10, %s2151_s11  ;;  %p2157_p7 = scmp.lt.s32.totalorder %s2151_s11, %s2151_s11 }
0x27bc   :  { %849 = vrot.lane.b32.xlu1 %v2495_v40, %s2204_s6 }
0x27bd   :  { %p2158_p8 = por %p2157_p7, %p2156_p6 }
0x27bf   :  { %p2159_p9 = pnand %p2158_p8, %p2152_p5 }
0x27c0   :  { %1638 = vrot.lane.b32.xlu1 %v1617_v27, %s2204_s6 }
0x27c4   :  { %1154 = vrot.lane.b32.xlu1 %v2521_v13, %s2203_s3 }
0x27c8   :  { %1312 = vrot.lane.b32.xlu1 %v2567_v62, %s2203_s3 }
0x27cc   :  { %1470 = vrot.lane.b32.xlu1 %v2597_v47, %s2203_s3 }
0x282a   :  { %v1621_v38 = vpop.permute.xlu1 %1620 }
0x282b   :  { %v1623_v25 = vmul.f32 %v2128_v23, %v1621_v38 }
0x282d   :  { %v1762_v33 = vpack.c.bf16 %v1623_v25, %v1623_v25  ;;  %1633 = vrot.lane.b32.xlu0 %v1623_v25, %s2203_s3 }
0x282e   :  { %v850_v35 = vpop.permute.xlu1 %849 }
0x282f   :  { %852 = vst.msk [vmem:[#allocation8] sm:$0xff] %vm100_vm1, %v850_v35  ;;  %1628 = vrot.lane.b32.xlu1 %v1762_v33, %s2203_s3 }
0x2831   :  { %1549 = vrot.lane.b32.xlu0 %v1545_v14, %s2203_s3 }
0x2832   :  { %v1639_v40 = vpop.permute.xlu1 %1638 }
0x2833   :  { %1641 = vst.msk [vmem:[#allocation8 + $0x8] sm:$0xff] %vm100_vm1, %v1639_v40 }
0x2834   :  { %2162 = shalt.err (!%p2159_p9)
}
0x2835   :  { %s2206_s12 = smov 128   ;;  %s2207_s13 = smov 8  }
0x2836   :  { %1665 = dma.vmem_to_hbm [thread:$0]  %s1660_s10, 256, %s2658_s8, [#allocation9], %s2206_s12, %s2206_s12, %s2207_s13   ;;  %v1155_v13 = vpop.permute.xlu1 %1154 }
0x2837   :  { %1157 = vst.msk [vmem:[#allocation2 + $0x4] sm:$0xf] %vm274_vm2, %v1155_v13  ;;  %s2208_s5 = smov [#allocation7]  }
0x2838   :  { %s1647_s16 = sshll.u32 %s2208_s5, 4  ;;  %s1648_s16 = int_to_ptr.vmem [resolvable:$true] %s1647_s16 }
0x2839   :  { %s2171_s17 = scalar_lea.vmem %s1648_s16, 256  ;;  %p2176_p11 = scmp.lt.s32.totalorder %s1648_s16, %s1648_s16 }
0x283a   :  { %v1313_v62 = vpop.permute.xlu1 %1312  ;;  %p2172_p10 = scmp.ne.s32.totalorder %s1648_s16, %s2171_s17  ;;  %p2177_p12 = scmp.lt.s32.totalorder %s2171_s17, %s2171_s17 }
0x283b   :  { %1315 = vst.msk [vmem:[#allocation2 + $0xc] sm:$0xf] %vm274_vm2, %v1313_v62 }
0x283c   :  { %p2178_p13 = por %p2177_p12, %p2176_p11 }
0x283e   :  { %v1471_v36 = vpop.permute.xlu1 %1470  ;;  %p2179_p0 = pnand %p2178_p13, %p2172_p10 }
0x283f   :  { %1473 = vst.msk [vmem:[#allocation2 + $0x14] sm:$0xf] %vm274_vm2, %v1471_v36 }
0x289f   :  { %v1634_v61 = vpop.permute.xlu0 %1633 }
0x28a0   :  { %1636 = vst.msk [vmem:[#allocation7 + $0x8] sm:$0xff] %vm100_vm1, %v1634_v61 }
0x28a1   :  { %v1629_v37 = vpop.permute.xlu1 %1628 }
0x28a2   :  { %2182 = shalt.err (!%p2179_p0)
}
0x28a3   :  { %1653 = dma.vmem_to_hbm [thread:$0]  %s1648_s16, 256, %s2657_s7, [#allocation6], %s2206_s12, %s2206_s12, %s2207_s13   ;;  %1631 = vst.msk [vmem:[#allocation2 + $0x1c] sm:$0xf] %vm274_vm2, %v1629_v37  ;;  %v1550_v32 = vpop.permute.xlu0 %1549 }
0x28a4   :  { %1552 = vst.msk [vmem:[#allocation2 + $0x18] sm:$0xf] %vm274_vm2, %v1550_v32 }
0x28a5   :  { %2193 = dma.done.wait [#allocation6], 256  }
0x28a6   :  { %2194 = vsyncadd [#allocation6], 4294967040 }
0x28a7   :  { %2195 = dma.done.wait [#allocation9], 256  }
0x28a8   :  { %2196 = vsyncadd [#allocation9], 4294967040 }
0x28a9   :  { %1672 = vsyncpa [#allocation5], 1 }
0x28aa   :  { %1673 = vsyncpa [#allocation6], 1 }
0x28ab   :  { %1674 = vsyncpa [#allocation9], 1 }

</bundles_post_ra>
